<compile_context>
chip_gen: v6e
topology: v6e:2x2x1
jax: 0.10.0
libtpu: 0.0.40
codegen_flags: <defaults>
</compile_context>

<pallas_src>
import math

import jax
import jax.numpy as jnp
import numpy as np
from jax import lax
from jax.experimental import pallas as pl
from jax.experimental.pallas import tpu as pltpu


# ----------------------------- Pallas kernel ------------------------------- #

def _attn_block_kernel(x_ref, gavg_ref, gamma_ref, beta_ref,
                       wqkv_ref, bqkv_ref, wp_ref, bp_ref, o_ref):
    """One batch element per grid step, channel-major layout.

    x_ref    : (C, HW)     input channels x pixels, f32
    gavg_ref : (C, C)      group-averaging matrix: 1/(Cg*HW) if same group else 0
    gamma/beta: (C, 1)     GroupNorm affine params
    wqkv_ref : (3C, C)     [Wq; Wk; Wv]  (conv weights, out x in)
    bqkv_ref : (3C, 1)     [bq; bk; bv]
    wp_ref   : (C, C)      Wp
    bp_ref   : (C, 1)      bp
    o_ref    : (C, HW)     output = x + proj_out(attention(norm(x)))
    """
    x = x_ref[...]                                        # (C, HW)
    c, hw = x.shape
    scale = 1.0 / math.sqrt(c)                            # int(c) ** (-0.5)

    # ---- GroupNorm(num_groups=8, eps=1e-6, affine=True) ------------------- #
    # Per-channel sums are lane (XLU) reductions; the per-group average is a
    # tiny (C,C)@(C,1) matmul against a precomputed group-membership matrix.
    csum = jnp.sum(x, axis=1, keepdims=True)              # (C, 1)  sum over HW
    csq = jnp.sum(x * x, axis=1, keepdims=True)           # (C, 1)
    gmean = jnp.dot(gavg_ref[...], csum,
                    preferred_element_type=jnp.float32)   # (C, 1) E[x] per group
    gex2 = jnp.dot(gavg_ref[...], csq,
                   preferred_element_type=jnp.float32)    # (C, 1) E[x^2] per group
    var = gex2 - gmean * gmean                            # biased variance
    inv_std = lax.rsqrt(var + 1e-6)
    h = (x - gmean) * (inv_std * gamma_ref[...]) + beta_ref[...]      # (C, HW)

    # ---- q, k, v : 1x1 convs == ONE packed (3C,C)@(C,HW) MXU matmul ------- #
    qkv = jnp.dot(wqkv_ref[...], h,
                  preferred_element_type=jnp.float32) + bqkv_ref[...]  # (3C, HW)
    q = qkv[0:c, :] * scale                               # fold scale into q
    k = qkv[c:2 * c, :]
    v = qkv[2 * c:3 * c, :]

    # ---- attention: softmax(q k^T / sqrt(C)) applied to v ------------------ #
    # s[j, i] = sum_c q[c, j] * k[c, i]   (contract channel dim; HWxHW lane-dense)
    s = lax.dot_general(q, k, (((0,), (0,)), ((), ())),
                        preferred_element_type=jnp.float32)            # (HW, HW)
    s_max = jnp.max(s, axis=-1, keepdims=True)
    e = jnp.exp(s - s_max)
    inv_denom = pl.reciprocal(jnp.sum(e, axis=-1, keepdims=True), approx=True)
    attn = e * inv_denom                                                # (HW, HW)
    # h_att[c, j] = sum_i v[c, i] * attn[j, i]
    h_att = lax.dot_general(v, attn, (((1,), (1,)), ((), ())),
                            preferred_element_type=jnp.float32)         # (C, HW)

    # ---- proj_out + residual ----------------------------------------------- #
    proj = jnp.dot(wp_ref[...], h_att,
                   preferred_element_type=jnp.float32) + bp_ref[...]    # (C, HW)
    o_ref[...] = (x + proj).astype(o_ref.dtype)


def attn_block_pallas(x, params):
    """x: (B, C, H, W) f32 NCHW. Returns (B, C, H, W) f32."""
    B, C, H, W = x.shape
    HW = H * W

    # Channel-major layout: (B, C, HW) — a free reshape, no transpose needed.
    x_t = x.reshape(B, C, HW)

    gavg = params["gavg"]
    gamma = params["gamma"]
    beta = params["beta"]
    wqkv = params["wqkv"]
    bqkv = params["bqkv"]
    wp = params["wp"]
    bp = params["bp"]

    flops_per_b = (2 * 3 * C * C * HW        # packed qkv matmul
                   + 2 * HW * HW * C         # q.k^T
                   + 2 * HW * HW * C         # attn.v
                   + 2 * C * C * HW          # proj
                   + 5 * HW * HW             # softmax elementwise
                   + 10 * C * HW)            # norm / bias / residual elementwise
    cost = pl.CostEstimate(
        flops=B * flops_per_b,
        transcendentals=B * (HW * HW + HW + C),
        bytes_accessed=4 * (2 * B * C * HW + 5 * C * C + 8 * C),
    )

    out_t = pl.pallas_call(
        _attn_block_kernel,
        out_shape=jax.ShapeDtypeStruct((B, C, HW), jnp.float32),
        grid=(B,),
        in_specs=[
            pl.BlockSpec((None, C, HW), lambda b: (b, 0, 0)),   # x (per batch)
            pl.BlockSpec((C, C), lambda b: (0, 0)),             # group-avg matrix
            pl.BlockSpec((C, 1), lambda b: (0, 0)),             # gamma
            pl.BlockSpec((C, 1), lambda b: (0, 0)),             # beta
            pl.BlockSpec((3 * C, C), lambda b: (0, 0)),         # packed Wq/Wk/Wv
            pl.BlockSpec((3 * C, 1), lambda b: (0, 0)),         # packed bq/bk/bv
            pl.BlockSpec((C, C), lambda b: (0, 0)),             # Wp
            pl.BlockSpec((C, 1), lambda b: (0, 0)),             # bp
        ],
        out_specs=pl.BlockSpec((None, C, HW), lambda b: (b, 0, 0)),
        compiler_params=pltpu.CompilerParams(
            dimension_semantics=("parallel",)),                 # megacore on v7x
        cost_estimate=cost,
    )(x_t, gavg, gamma, beta, wqkv, bqkv, wp, bp)

    return out_t.reshape(B, C, H, W)


# ------------------------------- Module ------------------------------------ #

class AttnBlockPallas:
    """JAX/Pallas port of the PyTorch AttnBlock module."""

    def __init__(self, in_channels, key):
        assert in_channels % 8 == 0, "GroupNorm(8) needs channels % 8 == 0"
        C = in_channels
        self.in_channels = C
        self.num_groups = 8
        self.eps = 1e-6

        ks = jax.random.split(key, 10)
        bound = 1.0 / math.sqrt(C)  # PyTorch Conv2d default init range

        def u(k, shape):
            return jax.random.uniform(k, shape, jnp.float32, -bound, bound)

        self.wq, self.bq = u(ks[0], (C, C)), u(ks[1], (C,))
        self.wk, self.bk = u(ks[2], (C, C)), u(ks[3], (C,))
        self.wv, self.bv = u(ks[4], (C, C)), u(ks[5], (C,))
        self.wp, self.bp = u(ks[6], (C, C)), u(ks[7], (C,))
        # Randomized affine params so the GroupNorm affine path is exercised.
        self.gamma = 1.0 + 0.1 * jax.random.normal(ks[8], (C,), jnp.float32)
        self.beta = 0.1 * jax.random.normal(ks[9], (C,), jnp.float32)

    def packed_params(self, hw):
        C, G = self.in_channels, self.num_groups
        Cg = C // G
        group_id = np.arange(C) // Cg
        gavg = (group_id[:, None] == group_id[None, :]).astype(np.float32)
        gavg = gavg / float(Cg * hw)
        return dict(
            gavg=jnp.asarray(gavg),
            gamma=self.gamma.reshape(C, 1),
            beta=self.beta.reshape(C, 1),
            wqkv=jnp.concatenate([self.wq, self.wk, self.wv], axis=0),   # (3C, C)
            bqkv=jnp.concatenate([self.bq, self.bk, self.bv]).reshape(3 * C, 1),
            wp=self.wp,
            bp=self.bp.reshape(C, 1),
        )

    def __call__(self, x):
        B, C, H, W = x.shape
        assert C == self.in_channels
        return attn_block_pallas(x, self.packed_params(H * W))


# ------------------------------ Reference ----------------------------------- #

def reference_attn_block(x, layer):
    """Pure-JAX replica of the PyTorch AttnBlock forward (full f32 precision)."""
    HI = lax.Precision.HIGHEST
    B, C, H, W = x.shape
    G, eps = layer.num_groups, layer.eps
    Cg = C // G

    xg = x.reshape(B, G, Cg, H, W)
    mean = xg.mean(axis=(2, 3, 4), keepdims=True)
    var = xg.var(axis=(2, 3, 4), keepdims=True)          # biased, as in GroupNorm
    hn = (xg - mean) / jnp.sqrt(var + eps)
    hn = hn.reshape(B, C, H, W) * layer.gamma.reshape(1, C, 1, 1) \
        + layer.beta.reshape(1, C, 1, 1)

    def conv1x1(h, w, b):
        return jnp.einsum('oc,bchw->bohw', w, h, precision=HI) \
            + b.reshape(1, -1, 1, 1)

    q = conv1x1(hn, layer.wq, layer.bq)
    k = conv1x1(hn, layer.wk, layer.bk)
    v = conv1x1(hn, layer.wv, layer.bv)

    HW = H * W
    q = q.reshape(B, C, HW).transpose(0, 2, 1)           # (B, HW, C)
    k = k.reshape(B, C, HW)                              # (B, C, HW)
    w_ = jnp.einsum('bjc,bci->bji', q, k, precision=HI) * (float(C) ** -0.5)
    w_ = jax.nn.softmax(w_, axis=2)
    v = v.reshape(B, C, HW)
    h_ = jnp.einsum('bci,bji->bcj', v, w_, precision=HI)  # (B, C, HW)
    h_ = h_.reshape(B, C, H, W)
    h_ = conv1x1(h_, layer.wp, layer.bp)
    return x + h_


# --------------------------------- Main ------------------------------------- #

if __name__ == "__main__":
    key = jax.random.PRNGKey(0)
    k_x, k_w = jax.random.split(key)

    batch, channels, H, W = 2, 32, 16, 16   # GroupNorm(8) => channels % 8 == 0

    x = jax.random.normal(k_x, (batch, channels, H, W), dtype=jnp.float32)
    block = AttnBlockPallas(channels, k_w)

    out = jax.block_until_ready(block(x))
    ref = jax.block_until_ready(reference_attn_block(x, block))

    assert out.shape == (batch, channels, H, W)
    assert out.dtype == jnp.float32
    # Tolerance allows for possible reduced-precision MXU passes on f32 operands
    # and the approximate (EUP) softmax reciprocal, while still catching any
    # structural/semantic error (those are O(0.1..1)).
    np.testing.assert_allclose(np.asarray(out), np.asarray(ref),
                               rtol=2e-2, atol=2e-2)

    print("KERNEL_OK")
</pallas_src>

<mosaic_0001>
module attributes {stable_mosaic.version = 11 : i64} {
  func.func @_attn_block_kernel(%arg0: i32, %arg1: memref<1x32x256xf32, #tpu.memory_space<vmem>>, %arg2: memref<32x32xf32, #tpu.memory_space<vmem>>, %arg3: memref<32x1xf32, #tpu.memory_space<vmem>>, %arg4: memref<32x1xf32, #tpu.memory_space<vmem>>, %arg5: memref<96x32xf32, #tpu.memory_space<vmem>>, %arg6: memref<96x1xf32, #tpu.memory_space<vmem>>, %arg7: memref<32x32xf32, #tpu.memory_space<vmem>>, %arg8: memref<32x1xf32, #tpu.memory_space<vmem>>, %arg9: memref<1x32x256xf32, #tpu.memory_space<vmem>>) attributes {dimension_semantics = [#tpu.dimension_semantics<parallel>], iteration_bounds = array<i64: 2>, scalar_prefetch = 0 : i64, scratch_operands = 0 : i64, tpu.core_type = #tpu.core_type<tc>, window_params = [{transform_indices = @transform_0, window_bounds = array<i64: 1, 32, 256>}, {pipeline_mode = #tpu.pipeline_mode<synchronous>, transform_indices = @transform_1, window_bounds = array<i64: 32, 32>}, {pipeline_mode = #tpu.pipeline_mode<synchronous>, transform_indices = @transform_2, window_bounds = array<i64: 32, 1>}, {pipeline_mode = #tpu.pipeline_mode<synchronous>, transform_indices = @transform_3, window_bounds = array<i64: 32, 1>}, {pipeline_mode = #tpu.pipeline_mode<synchronous>, transform_indices = @transform_4, window_bounds = array<i64: 96, 32>}, {pipeline_mode = #tpu.pipeline_mode<synchronous>, transform_indices = @transform_5, window_bounds = array<i64: 96, 1>}, {pipeline_mode = #tpu.pipeline_mode<synchronous>, transform_indices = @transform_6, window_bounds = array<i64: 32, 32>}, {pipeline_mode = #tpu.pipeline_mode<synchronous>, transform_indices = @transform_7, window_bounds = array<i64: 32, 1>}, {transform_indices = @transform_8, window_bounds = array<i64: 1, 32, 256>}]} {
    %c0 = arith.constant 0 : index
    %c0_0 = arith.constant 0 : index
    %c0_1 = arith.constant 0 : index
    %0 = vector.load %arg1[%c0, %c0_0, %c0_1] : memref<1x32x256xf32, #tpu.memory_space<vmem>>, vector<1x32x256xf32>
    %1 = vector.shape_cast %0 : vector<1x32x256xf32> to vector<32x256xf32>
    %cst = arith.constant dense<0.000000e+00> : vector<32xf32>
    %2 = vector.multi_reduction <add>, %1, %cst [1] : vector<32x256xf32> to vector<32xf32>
    %3 = vector.shape_cast %2 : vector<32xf32> to vector<32x1xf32>
    %4 = arith.mulf %1, %1 : vector<32x256xf32>
    %cst_2 = arith.constant dense<0.000000e+00> : vector<32xf32>
    %5 = vector.multi_reduction <add>, %4, %cst_2 [1] : vector<32x256xf32> to vector<32xf32>
    %6 = vector.shape_cast %5 : vector<32xf32> to vector<32x1xf32>
    %c0_3 = arith.constant 0 : index
    %c0_4 = arith.constant 0 : index
    %7 = vector.load %arg2[%c0_3, %c0_4] : memref<32x32xf32, #tpu.memory_space<vmem>>, vector<32x32xf32>
    %cst_5 = arith.constant dense<0.000000e+00> : vector<32x1xf32>
    %8 = tpu.matmul %7, %3, %cst_5 {dimension_numbers = #tpu.dot_dimension_numbers<[1], [0], [0], [1], [0, 0, 1, 1], [], []>} : vector<32x32xf32>, vector<32x1xf32>, vector<32x1xf32> -> vector<32x1xf32>
    %c0_6 = arith.constant 0 : index
    %c0_7 = arith.constant 0 : index
    %9 = vector.load %arg2[%c0_6, %c0_7] : memref<32x32xf32, #tpu.memory_space<vmem>>, vector<32x32xf32>
    %cst_8 = arith.constant dense<0.000000e+00> : vector<32x1xf32>
    %10 = tpu.matmul %9, %6, %cst_8 {dimension_numbers = #tpu.dot_dimension_numbers<[1], [0], [0], [1], [0, 0, 1, 1], [], []>} : vector<32x32xf32>, vector<32x1xf32>, vector<32x1xf32> -> vector<32x1xf32>
    %11 = arith.mulf %8, %8 : vector<32x1xf32>
    %12 = arith.subf %10, %11 : vector<32x1xf32>
    %cst_9 = arith.constant 9.99999997E-7 : f32
    %13 = vector.broadcast %cst_9 : f32 to vector<32x1xf32>
    %14 = arith.addf %12, %13 : vector<32x1xf32>
    %15 = math.rsqrt %14 : vector<32x1xf32>
    %16 = vector.broadcast %8 : vector<32x1xf32> to vector<32x256xf32>
    %17 = arith.subf %1, %16 : vector<32x256xf32>
    %c0_10 = arith.constant 0 : index
    %c0_11 = arith.constant 0 : index
    %18 = vector.load %arg3[%c0_10, %c0_11] : memref<32x1xf32, #tpu.memory_space<vmem>>, vector<32x1xf32>
    %19 = arith.mulf %15, %18 : vector<32x1xf32>
    %20 = vector.broadcast %19 : vector<32x1xf32> to vector<32x256xf32>
    %21 = arith.mulf %17, %20 : vector<32x256xf32>
    %c0_12 = arith.constant 0 : index
    %c0_13 = arith.constant 0 : index
    %22 = vector.load %arg4[%c0_12, %c0_13] : memref<32x1xf32, #tpu.memory_space<vmem>>, vector<32x1xf32>
    %23 = vector.broadcast %22 : vector<32x1xf32> to vector<32x256xf32>
    %24 = arith.addf %21, %23 : vector<32x256xf32>
    %c0_14 = arith.constant 0 : index
    %c0_15 = arith.constant 0 : index
    %25 = vector.load %arg5[%c0_14, %c0_15] : memref<96x32xf32, #tpu.memory_space<vmem>>, vector<96x32xf32>
    %cst_16 = arith.constant dense<0.000000e+00> : vector<96x256xf32>
    %26 = tpu.matmul %25, %24, %cst_16 {dimension_numbers = #tpu.dot_dimension_numbers<[1], [0], [0], [1], [0, 0, 1, 1], [], []>} : vector<96x32xf32>, vector<32x256xf32>, vector<96x256xf32> -> vector<96x256xf32>
    %c0_17 = arith.constant 0 : index
    %c0_18 = arith.constant 0 : index
    %27 = vector.load %arg6[%c0_17, %c0_18] : memref<96x1xf32, #tpu.memory_space<vmem>>, vector<96x1xf32>
    %28 = vector.broadcast %27 : vector<96x1xf32> to vector<96x256xf32>
    %29 = arith.addf %26, %28 : vector<96x256xf32>
    %30 = vector.extract_strided_slice %29 {offsets = [0, 0], sizes = [32, 256], strides = [1, 1]} : vector<96x256xf32> to vector<32x256xf32>
    %cst_19 = arith.constant 0.176776692 : f32
    %31 = vector.broadcast %cst_19 : f32 to vector<32x256xf32>
    %32 = arith.mulf %30, %31 : vector<32x256xf32>
    %33 = vector.extract_strided_slice %29 {offsets = [32, 0], sizes = [32, 256], strides = [1, 1]} : vector<96x256xf32> to vector<32x256xf32>
    %34 = vector.extract_strided_slice %29 {offsets = [64, 0], sizes = [32, 256], strides = [1, 1]} : vector<96x256xf32> to vector<32x256xf32>
    %cst_20 = arith.constant dense<0.000000e+00> : vector<256x256xf32>
    %35 = tpu.matmul %32, %33, %cst_20 {dimension_numbers = #tpu.dot_dimension_numbers<[0], [0], [1], [1], [0, 1, 1, 1], [], []>} : vector<32x256xf32>, vector<32x256xf32>, vector<256x256xf32> -> vector<256x256xf32>
    %cst_21 = arith.constant dense<0xFF800000> : vector<256xf32>
    %36 = vector.multi_reduction <maximumf>, %35, %cst_21 [1] : vector<256x256xf32> to vector<256xf32>
    %37 = vector.shape_cast %36 : vector<256xf32> to vector<256x1xf32>
    %38 = vector.broadcast %37 : vector<256x1xf32> to vector<256x256xf32>
    %39 = arith.subf %35, %38 : vector<256x256xf32>
    %40 = math.exp %39 : vector<256x256xf32>
    %cst_22 = arith.constant dense<0.000000e+00> : vector<256xf32>
    %41 = vector.multi_reduction <add>, %40, %cst_22 [1] : vector<256x256xf32> to vector<256xf32>
    %42 = vector.shape_cast %41 : vector<256xf32> to vector<256x1xf32>
    %43 = tpu.reciprocal %42 {approx = true} : vector<256x1xf32> -> vector<256x1xf32>
    %44 = vector.broadcast %43 : vector<256x1xf32> to vector<256x256xf32>
    %45 = arith.mulf %40, %44 : vector<256x256xf32>
    %cst_23 = arith.constant dense<0.000000e+00> : vector<32x256xf32>
    %46 = tpu.matmul %34, %45, %cst_23 {dimension_numbers = #tpu.dot_dimension_numbers<[1], [1], [0], [0], [0, 0, 1, 0], [], []>} : vector<32x256xf32>, vector<256x256xf32>, vector<32x256xf32> -> vector<32x256xf32>
    %c0_24 = arith.constant 0 : index
    %c0_25 = arith.constant 0 : index
    %47 = vector.load %arg7[%c0_24, %c0_25] : memref<32x32xf32, #tpu.memory_space<vmem>>, vector<32x32xf32>
    %cst_26 = arith.constant dense<0.000000e+00> : vector<32x256xf32>
    %48 = tpu.matmul %47, %46, %cst_26 {dimension_numbers = #tpu.dot_dimension_numbers<[1], [0], [0], [1], [0, 0, 1, 1], [], []>} : vector<32x32xf32>, vector<32x256xf32>, vector<32x256xf32> -> vector<32x256xf32>
    %c0_27 = arith.constant 0 : index
    %c0_28 = arith.constant 0 : index
    %49 = vector.load %arg8[%c0_27, %c0_28] : memref<32x1xf32, #tpu.memory_space<vmem>>, vector<32x1xf32>
    %50 = vector.broadcast %49 : vector<32x1xf32> to vector<32x256xf32>
    %51 = arith.addf %48, %50 : vector<32x256xf32>
    %52 = arith.addf %1, %51 : vector<32x256xf32>
    %c0_29 = arith.constant 0 : index
    %c0_30 = arith.constant 0 : index
    %c0_31 = arith.constant 0 : index
    %53 = vector.load %arg9[%c0_29, %c0_30, %c0_31] : memref<1x32x256xf32, #tpu.memory_space<vmem>>, vector<1x32x256xf32>
    %54 = vector.shape_cast %53 : vector<1x32x256xf32> to vector<32x256xf32>
    %55 = vector.shape_cast %52 : vector<32x256xf32> to vector<1x32x256xf32>
    tpu.vector_store %arg9[%c0_29, %c0_30, %c0_31], %55 {strides = array<i32>} : memref<1x32x256xf32, #tpu.memory_space<vmem>>, vector<1x32x256xf32>,
    return
  }
  func.func @transform_0(%arg0: i32) -> (i32, i32, i32) {
    %c0_i32 = arith.constant 0 : i32
    %c0_i32_0 = arith.constant 0 : i32
    %c0_i32_1 = arith.constant 0 : i32
    return %arg0, %c0_i32, %c0_i32_0 : i32, i32, i32
  }
  func.func @transform_1(%arg0: i32) -> (i32, i32) {
    %c0_i32 = arith.constant 0 : i32
    %c0_i32_0 = arith.constant 0 : i32
    %c0_i32_1 = arith.constant 0 : i32
    return %c0_i32, %c0_i32_0 : i32, i32
  }
  func.func @transform_2(%arg0: i32) -> (i32, i32) {
    %c0_i32 = arith.constant 0 : i32
    %c0_i32_0 = arith.constant 0 : i32
    %c0_i32_1 = arith.constant 0 : i32
    return %c0_i32, %c0_i32_0 : i32, i32
  }
  func.func @transform_3(%arg0: i32) -> (i32, i32) {
    %c0_i32 = arith.constant 0 : i32
    %c0_i32_0 = arith.constant 0 : i32
    %c0_i32_1 = arith.constant 0 : i32
    return %c0_i32, %c0_i32_0 : i32, i32
  }
  func.func @transform_4(%arg0: i32) -> (i32, i32) {
    %c0_i32 = arith.constant 0 : i32
    %c0_i32_0 = arith.constant 0 : i32
    %c0_i32_1 = arith.constant 0 : i32
    return %c0_i32, %c0_i32_0 : i32, i32
  }
  func.func @transform_5(%arg0: i32) -> (i32, i32) {
    %c0_i32 = arith.constant 0 : i32
    %c0_i32_0 = arith.constant 0 : i32
    %c0_i32_1 = arith.constant 0 : i32
    return %c0_i32, %c0_i32_0 : i32, i32
  }
  func.func @transform_6(%arg0: i32) -> (i32, i32) {
    %c0_i32 = arith.constant 0 : i32
    %c0_i32_0 = arith.constant 0 : i32
    %c0_i32_1 = arith.constant 0 : i32
    return %c0_i32, %c0_i32_0 : i32, i32
  }
  func.func @transform_7(%arg0: i32) -> (i32, i32) {
    %c0_i32 = arith.constant 0 : i32
    %c0_i32_0 = arith.constant 0 : i32
    %c0_i32_1 = arith.constant 0 : i32
    return %c0_i32, %c0_i32_0 : i32, i32
  }
  func.func @transform_8(%arg0: i32) -> (i32, i32, i32) {
    %c0_i32 = arith.constant 0 : i32
    %c0_i32_0 = arith.constant 0 : i32
    %c0_i32_1 = arith.constant 0 : i32
    return %arg0, %c0_i32, %c0_i32_0 : i32, i32, i32
  }
}

</mosaic_0001>

<bundles_post_ra>
// kernel: tpu_custom_call.1
= control target key start
LH: loop header
LB: loop body
LE: loop exit
PB: predicated region body
PF: predicated region fallthrough
CT: control target
= control target key end

     0   :  { %13 = vsyncpa [#allocation3], 0  ;;  %s3525_s0 = inlined_call_operand.vmem [shape: f32[2,32,256], index: 0, kind: input, shape index: {}]   ;;  %s3526_s1 = inlined_call_operand.vmem [shape: f32[32,32], index: 1, kind: input, shape index: {}]   ;;  %s3527_s2 = inlined_call_operand.vmem [shape: f32[32,1], index: 2, kind: input, shape index: {}]   ;;  %s3528_s3 = inlined_call_operand.vmem [shape: f32[32,1], index: 3, kind: input, shape index: {}]   ;;  %s3529_s4 = inlined_call_operand.vmem [shape: f32[96,32], index: 4, kind: input, shape index: {}]   ;;  %s3530_s5 = inlined_call_operand.vmem [shape: f32[96,1], index: 5, kind: input, shape index: {}]   ;;  %s3531_s6 = inlined_call_operand.vmem [shape: f32[32,32], index: 6, kind: input, shape index: {}]   ;;  %s3532_s7 = inlined_call_operand.vmem [shape: f32[32,1], index: 7, kind: input, shape index: {}]   ;;  %s3533_s8 = inlined_call_operand.hbm [shape: f32[2,32,256], index: 8, kind: output, shape index: {}]  }
   0x1   :  { %15 = vsyncpa [#allocation3 + $0x1], 0  ;;  %s2594_s27 = smov 0   ;;  %s2596_s28 = smov 0  }
   0x2   :  { %s2598_s29 = smov 0   ;;  %s2600_s30 = smov 0  }
   0x3 LB: > { %s2615_s9 = sadd.s32 4294967295, %s2542_s30   ;;  %s2115_s10 = sadd.s32 4294967294, %s2542_s30   ;;  %s2542_s30 = sphi %s2600_s30, %s3619_s30   ;;  %s2538_s29 = sphi %s2598_s29, %s3618_s29   ;;  %s2534_s28 = sphi %s2596_s28, %s3617_s28   ;;  %s2530_s27 = sphi %s2594_s27, %s3616_s27  }
   0x4   : > { %s2619_s11 = sadd.s32 1, %s2542_s30   ;;  %s201_s12 = sadd.s32 1, %s2538_s29 }
   0x5   : > { %s198_s13 = ssub.s32 %s2542_s30, %s2619_s11  ;;  %p211_p0 = scmp.ne.s32.totalorder %s2538_s29, %s2534_s28 }
   0x6   : > { %p199_p1 = scmp.eq.s32.totalorder %s198_s13, 0  ;;  %p212_p2 = scmp.eq.s32.totalorder %s2615_s9, 1 }
   0x7   : > { %p217_p3 = scmp.ne.s32.totalorder %s2534_s28, %s2530_s27  ;;  %p218_p4 = scmp.eq.s32.totalorder %s2115_s10, 1 }
   0x8   : > { %s2630_s14 = scalar_select %p199_p1, %s2538_s29, %s201_s12  }
   0x9   : > { %p2632_p5 = por %p212_p2, %p211_p0  ;;  %p2636_p6 = por %p218_p4, %p217_p3 }
   0xa   : > { %p2118_p7 = scmp.ge.s32.totalorder %s2542_s30, 1  ;;  %p265_p8 = scmp.lt.s32.totalorder %s2542_s30, 3 }
   0xc   : > { %p266_p9 = pnand %p2118_p7, %p265_p8 }
   0xe   : > { %269 = sbr.rel (%p266_p9) target bundleno = 1997 (0x7cd), region = 52 }
  0x13   : > { %p299_p10 = scmp.lt.s32.totalorder %s2615_s9, 1  ;;  %v344_v24 = vld [vmem:[%s3526_s1] sm:$0xff]  ;;  %vm348_vm0 = vcmask 261120   ;;  %v2544_v25 = vmov 0   ;;  %v345_v32 = vld [vmem:[%s3526_s1 + $0x8] sm:$0xff]  ;;  %v346_v33 = vld [vmem:[%s3526_s1 + $0x10] sm:$0xff] }
  0x14   : > { %2209 = vmatprep.mubr.msk.f32.mxu0 %vm348_vm0, %v344_v24  ;;  %2223 = vmatprep.mubr.msk.f32.mxu1 %vm348_vm0, %v344_v24  ;;  %v347_v36 = vld [vmem:[%s3526_s1 + $0x18] sm:$0xff]  ;;  %v613_v54 = vld [vmem:[%s3528_s3 + $0x10] sm:$0xff]  ;;  %v576_v59 = vld [vmem:[%s3527_s2 + $0x8] sm:$0xff]  ;;  %s296_s26 = sand.u32 1, %s2534_s28   ;;  %s2184_s13 = sshll.u32 %s2615_s9, 10 }
  0x15   : > { %s300_s17 = scalar_select %p299_p10, %s2615_s9, 1  ;;  %2273 = vset.pattern.permute.xlu1 %v2544_v25  ;;  %2272 = vset.pattern.permute.xlu0 %v2544_v25  ;;  %v614_v40 = vld [vmem:[%s3528_s3 + $0x18] sm:$0xff]  ;;  %v575_v61 = vld [vmem:[%s3527_s2] sm:$0xff]  ;;  %v660_v25 = vld [vmem:[%s3530_s5 + $0x28] sm:$0xff] }
  0x16   : > { %v662_v24 = vld [vmem:[%s3530_s5 + $0x38] sm:$0xff]  ;;  %s2119_s10 = sshll.u32 %s296_s26, 6  ;;  %s3476_s20 = scalar_lea.hbm %s3533_s8, %s2184_s13 }
  0x17   : > { %s2183_s18 = sshll.u32 %s300_s17, 6  ;;  %s3457_s12 = scalar_lea.vmem [#allocation2], %s2119_s10 }
  0x18   : > { %s2647_s21 = scalar_lea.vmem %s3525_s0, %s2183_s18  ;;  %s2053_s17 = sshll.u32 %s3457_s12, 4  ;;  %s3478_s17 = int_to_ptr.vmem [resolvable:$true] %s2053_s17 }
  0x19   : > { %v2650_v0 = vld [vmem:[%s2647_s21 + $0x30] sm:$0xff]  ;;  %v2653_v1 = vld [vmem:[%s2647_s21 + $0x38] sm:$0xff]  ;;  %v2664_v5 = vld [vmem:[%s2647_s21 + $0x20] sm:$0xff]  ;;  %s3485_s9 = scalar_lea.sflag [#allocation3], %s296_s26  ;;  %s2482_s22 = scalar_lea.vmem %s3478_s17, 1024 }
  0x1a   : > { %v2656_v2 = vld [vmem:[%s2647_s21 + $0x10] sm:$0xff]  ;;  %v321_v3 = vadd.f32 %v2653_v1, %v2650_v0  ;;  %v2661_v4 = vld [vmem:[%s2647_s21 + $0x18] sm:$0xff]  ;;  %v2667_v6 = vld [vmem:[%s2647_s21 + $0x28] sm:$0xff]  ;;  %v330_v7 = vmul.f32 %v2650_v0, %v2650_v0  ;;  %v331_v8 = vmul.f32 %v2653_v1, %v2653_v1  ;;  %v328_v11 = vmul.f32 %v2664_v5, %v2664_v5  ;;  %p2483_p11 = scmp.ne.s32.totalorder %s3478_s17, %s2482_s22  ;;  %s2546_s23 = smov [#allocation2]  }
  0x1b   : > { %v315_v9 = vadd.f32 %v2661_v4, %v2656_v2  ;;  %v318_v10 = vadd.f32 %v2667_v6, %v2664_v5  ;;  %v329_v12 = vmul.f32 %v2667_v6, %v2667_v6  ;;  %v2682_v14 = vld [vmem:[%s2647_s21] sm:$0xff]  ;;  %v2685_v15 = vld [vmem:[%s2647_s21 + $0x8] sm:$0xff]  ;;  %v326_v17 = vmul.f32 %v2656_v2, %v2656_v2  ;;  %s2486_s24 = sshll.u32 %s2546_s23, 4  ;;  %s2487_s24 = int_to_ptr.vmem [resolvable:$false] %s2486_s24 }
  0x1c   : > { %322 = vadd.xlane.f32.xlu0 %v321_v3  ;;  %v341_v13 = vadd.f32 %v331_v8, %v330_v7  ;;  %v327_v18 = vmul.f32 %v2661_v4, %v2661_v4  ;;  %v312_v19 = vadd.f32 %v2685_v15, %v2682_v14  ;;  %v324_v20 = vmul.f32 %v2682_v14, %v2682_v14  ;;  %v578_v3 = vld [vmem:[%s3527_s2 + $0x18] sm:$0xff]  ;;  %p2484_p12 = pnand %p2483_p11, %p2632_p5  ;;  %s2488_s25 = scalar_lea.vmem %s2487_s24, 2048 }
  0x1d   : > { %316 = vadd.xlane.f32.xlu1 %v315_v9  ;;  %v338_v16 = vadd.f32 %v329_v12, %v328_v11  ;;  %v325_v21 = vmul.f32 %v2685_v15, %v2685_v15  ;;  %v611_v11 = vld [vmem:[%s3528_s3] sm:$0xff]  ;;  %v577_v12 = vld [vmem:[%s3527_s2 + $0x10] sm:$0xff]  ;;  %p2489_p0 = scmp.lt.s32.totalorder %s3478_s17, %s2487_s24  ;;  %p2490_p1 = scmp.lt.s32.totalorder %s2488_s25, %s2482_s22 }
  0x1e   : > { %v335_v22 = vadd.f32 %v327_v18, %v326_v17  ;;  %v612_v17 = vld [vmem:[%s3528_s3 + $0x8] sm:$0xff]  ;;  %v658_v18 = vld [vmem:[%s3530_s5 + $0x18] sm:$0xff]  ;;  %p2485_p13 = pneg %p2484_p12 }
  0x1f   : > { %v332_v23 = vadd.f32 %v325_v21, %v324_v20  ;;  %v3534_v20 = vmov 0.0   ;;  %v661_v21 = vld [vmem:[%s3530_s5 + $0x30] sm:$0xff]  ;;  %p2491_p2 = por %p2490_p1, %p2489_p0 }
  0x20   : > { %319 = vadd.xlane.f32.xlu0 %v318_v10 }
  0x21   : > { %342 = vadd.xlane.f32.xlu1 %v341_v13  ;;  %p2492_p3 = pnand %p2491_p2, %p2485_p13 }
  0x24   : > { %339 = vadd.xlane.f32.xlu0 %v338_v16  ;;  %v656_v16 = vld [vmem:[%s3530_s5 + $0x8] sm:$0xff] }
  0x25   : > { %313 = vadd.xlane.f32.xlu1 %v312_v19  ;;  %v655_v19 = vld [vmem:[%s3530_s5] sm:$0xff] }
  0x28   : > { %336 = vadd.xlane.f32.xlu0 %v335_v22  ;;  %v657_v22 = vld [vmem:[%s3530_s5 + $0x10] sm:$0xff] }
  0x29   : > { %333 = vadd.xlane.f32.xlu1 %v332_v23  ;;  %v659_v23 = vld [vmem:[%s3530_s5 + $0x20] sm:$0xff] }
  0xa5   : > { %v323_v26 = vpop.xlane.xlu0 %322 }
  0xa6   : > { %v317_v27 = vpop.xlane.xlu1 %316  ;;  %2201 = vmatprep.subr.mxu0 %v323_v26 }
  0xa7   : > { %2202 = vmatpush3.msra.mxu0 %v323_v26 }
  0xa9   : > { %v320_v28 = vpop.xlane.xlu0 %319 }
  0xaa   : > { %v343_v29 = vpop.xlane.xlu1 %342  ;;  %2203 = vmatprep.subr.mxu0 %v320_v28 }
  0xab   : > { %2204 = vmatpush3.msra.mxu0 %v320_v28  ;;  %2215 = vmatprep.subr.mxu1 %v343_v29 }
  0xac   : > { %2205 = vmatprep.subr.mxu0 %v317_v27  ;;  %2216 = vmatpush3.msra.mxu1 %v343_v29 }
  0xad   : > { %v340_v30 = vpop.xlane.xlu0 %339  ;;  %2206 = vmatpush3.msra.mxu0 %v317_v27 }
  0xae   : > { %v314_v31 = vpop.xlane.xlu1 %313  ;;  %2217 = vmatprep.subr.mxu1 %v340_v30 }
  0xaf   : > { %2207 = vmatprep.subr.mxu0 %v314_v31  ;;  %2218 = vmatpush3.msra.mxu1 %v340_v30 }
  0xb0   : > { %2208 = vmatpush3.msra.mxu0 %v314_v31 }
  0xb1   : > { %2210 = vmatmul.mubr.msk.f32.vlgmr.msra.gmra.mxu0 %vm348_vm0, %v345_v32  ;;  %v337_v34 = vpop.xlane.xlu0 %336 }
  0xb2   : > { %2219 = vmatprep.subr.mxu1 %v337_v34  ;;  %v334_v35 = vpop.xlane.xlu1 %333  ;;  %2212 = vmatprep.mubr.msk.f32.mxu0 %vm348_vm0, %v346_v33 }
  0xb3   : > { %2220 = vmatpush3.msra.mxu1 %v337_v34 }
  0xb4   : > { %2221 = vmatprep.subr.mxu1 %v334_v35 }
  0xb5   : > { %2222 = vmatpush3.msra.mxu1 %v334_v35  ;;  %2213 = vmatmul.mubr.msk.f32.gmra.mxu0 %vm348_vm0, %v347_v36 }
  0xb6   : > { %2224 = vmatmul.mubr.msk.f32.vlgmr.msra.gmra.mxu1 %vm348_vm0, %v345_v32  ;;  %827 = vmatprep.mubr.f32.mxu0 %v3534_v20 }
  0xb7   : > { %2226 = vmatprep.mubr.msk.f32.mxu1 %vm348_vm0, %v346_v33 }
  0xba   : > { %2227 = vmatmul.mubr.msk.f32.gmra.mxu1 %vm348_vm0, %v347_v36 }
  0xbb   : > { %1132 = vmatprep.mubr.f32.mxu1 %v3534_v20 }
 0x171   : > { %v2211_v37 = vpop.f32.mrf.mxu0 }
 0x172   : > { %554 = vperm.xlu1 %2273, %v2211_v37   ;;  %v532_v38 = vmul.f32 %v2211_v37, %v2211_v37 }
 0x173   : > { %v427_v39 = vpop.f32.mrf.mxu0 }
 0x174   : > { %v531_v43 = vmul.f32 %v427_v39, %v427_v39 }
 0x175   : > { %v2214_v41 = vpop.f32.mrf.mxu0 }
 0x176   : > { %632 = vperm.xlu1 %2273, %v614_v40   ;;  %v2225_v42 = vpop.f32.mrf.mxu1  ;;  %564 = vperm.xlu0 %2272, %v2214_v41   ;;  %v534_v44 = vmul.f32 %v2214_v41, %v2214_v41 }
 0x177   : > { %v536_v45 = vsub.f32 %v2225_v42, %v532_v38  ;;  %v437_v46 = vpop.f32.mrf.mxu0 }
 0x178   : > { %v512_v47 = vpop.f32.mrf.mxu1  ;;  %v533_v51 = vmul.f32 %v437_v46, %v437_v46 }
 0x179   : > { %v540_v48 = vadd.f32 1e-06, %v536_v45  ;;  %v535_v49 = vsub.f32 %v512_v47, %v531_v43 }
 0x17a   : > { %549 = vperm.xlu1 %2273, %v427_v39   ;;  %v2228_v50 = vpop.f32.mrf.mxu1 }
 0x17b   : > { %2274 = vrsqrt.f32 %v540_v48  ;;  %v539_v52 = vadd.f32 1e-06, %v535_v49  ;;  %v538_v53 = vsub.f32 %v2228_v50, %v534_v44 }
 0x17c   : > { %v522_v55 = vpop.f32.mrf.mxu1 }
 0x17d   : > { %2276 = vrsqrt.f32 %v539_v52  ;;  %v542_v56 = vadd.f32 1e-06, %v538_v53  ;;  %v537_v57 = vsub.f32 %v522_v55, %v533_v51 }
 0x17e   : > { %627 = vperm.xlu1 %2273, %v613_v54  }
 0x17f   : > { %2278 = vrsqrt.f32 %v542_v56  ;;  %v541_v58 = vadd.f32 1e-06, %v537_v57  ;;  %v645_v56 = vld [vmem:[%s3529_s4 + $0x10] sm:$0xff]  ;;  %v646_v57 = vld [vmem:[%s3529_s4 + $0x18] sm:$0xff] }
 0x181   : > { %2280 = vrsqrt.f32 %v541_v58  ;;  %v647_v58 = vld [vmem:[%s3529_s4 + $0x20] sm:$0xff] }
 0x182   : > { %559 = vperm.xlu1 %2273, %v437_v46  }
 0x188   : > { %v2275_v60 = vpop.eup %2274 }
 0x189   : > { %v580_v62 = vmul.f32 %v2275_v60, %v576_v59  ;;  %v648_v59 = vld [vmem:[%s3529_s4 + $0x28] sm:$0xff]  ;;  %v649_v60 = vld [vmem:[%s3529_s4 + $0x30] sm:$0xff] }
 0x18a   : > { %v2277_v63 = vpop.eup %2276 }
 0x18b   : > { %590 = vperm.xlu1 %2273, %v580_v62   ;;  %v579_v7 = vmul.f32 %v2277_v63, %v575_v61  ;;  %v650_v61 = vld [vmem:[%s3529_s4 + $0x38] sm:$0xff] }
 0x18c   : > { %v2279_v8 = vpop.eup %2278 }
 0x18d   : > { %585 = vperm.xlu0 %2272, %v579_v7   ;;  %v582_v9 = vmul.f32 %v2279_v8, %v578_v3 }
 0x18e   : > { %v2281_v10 = vpop.eup %2280 }
 0x18f   : > { %600 = vperm.xlu1 %2273, %v582_v9   ;;  %v581_v13 = vmul.f32 %v2281_v10, %v577_v12 }
 0x191   : > { %617 = vperm.xlu0 %2272, %v611_v11  }
 0x193   : > { %595 = vperm.xlu1 %2273, %v581_v13  }
 0x195   : > { %674 = vperm.xlu0 %2272, %v656_v16  }
 0x197   : > { %622 = vperm.xlu1 %2273, %v612_v17  }
 0x199   : > { %684 = vperm.xlu0 %2272, %v658_v18  }
 0x19b   : > { %669 = vperm.xlu1 %2273, %v655_v19  }
 0x19d   : > { %699 = vperm.xlu0 %2272, %v661_v21  }
 0x19f   : > { %679 = vperm.xlu1 %2273, %v657_v22  }
 0x1a1   : > { %689 = vperm.xlu0 %2272, %v659_v23  }
 0x1a3   : > { %704 = vperm.xlu1 %2273, %v662_v24  }
 0x1a7   : > { %694 = vperm.xlu1 %2273, %v660_v25  }
 0x1ed   : > { %v555_v26 = vpop.permute.xlu1 %554 }
 0x1ee   : > { %v569_v44 = vsub.f32 %v2656_v2, %v555_v26  ;;  %v570_v45 = vsub.f32 %v2661_v4, %v555_v26 }
 0x1f1   : > { %v633_v27 = vpop.permute.xlu1 %632  ;;  %v565_v31 = vpop.permute.xlu0 %564 }
 0x1f2   : > { %v573_v33 = vsub.f32 %v2650_v0, %v565_v31  ;;  %v574_v34 = vsub.f32 %v2653_v1, %v565_v31 }
 0x1f5   : > { %v550_v28 = vpop.permute.xlu1 %549 }
 0x1f6   : > { %v568_v0 = vsub.f32 %v2685_v15, %v550_v28  ;;  %v643_v15 = vld [vmem:[%s3529_s4] sm:$0xff] }
 0x1f9   : > { %v628_v29 = vpop.permute.xlu1 %627 }
 0x1fd   : > { %v560_v30 = vpop.permute.xlu1 %559 }
 0x1fe   : > { %v571_v39 = vsub.f32 %v2664_v5, %v560_v30  ;;  %v572_v40 = vsub.f32 %v2667_v6, %v560_v30  ;;  %v567_v5 = vsub.f32 %v2682_v14, %v550_v28  ;;  %v644_v14 = vld [vmem:[%s3529_s4 + $0x8] sm:$0xff] }
 0x206   : > { %v591_v32 = vpop.permute.xlu1 %590 }
 0x207   : > { %v605_v1 = vmul.f32 %v591_v32, %v569_v44  ;;  %v606_v48 = vmul.f32 %v591_v32, %v570_v45 }
 0x208   : > { %v586_v38 = vpop.permute.xlu0 %585 }
 0x209   : > { %v604_v52 = vmul.f32 %v586_v38, %v568_v0  ;;  %v603_v2 = vmul.f32 %v586_v38, %v567_v5 }
 0x20a   : > { %v601_v35 = vpop.permute.xlu1 %600 }
 0x20b   : > { %v609_v36 = vmul.f32 %v601_v35, %v573_v33  ;;  %v610_v37 = vmul.f32 %v601_v35, %v574_v34 }
 0x20c   : > { %v618_v6 = vpop.permute.xlu0 %617 }
 0x20d   : > { %v641_v41 = vadd.f32 %v633_v27, %v609_v36  ;;  %v642_v42 = vadd.f32 %v633_v27, %v610_v37  ;;  %v636_v4 = vadd.f32 %v618_v6, %v604_v52  ;;  %v635_v55 = vadd.f32 %v618_v6, %v603_v2 }
 0x20e   : > { %v596_v43 = vpop.permute.xlu1 %595 }
 0x20f   : > { %v607_v46 = vmul.f32 %v596_v43, %v571_v39  ;;  %v608_v47 = vmul.f32 %v596_v43, %v572_v40  ;;  %787 = vmatprep.subr.mxu0 %v642_v42 }
 0x210   : > { %788 = vmatpush1.msra.mxu0 %v641_v41  ;;  %v675_v10 = vpop.permute.xlu0 %674 }
 0x211   : > { %v639_v49 = vadd.f32 %v628_v29, %v607_v46  ;;  %v640_v50 = vadd.f32 %v628_v29, %v608_v47 }
 0x212   : > { %v623_v51 = vpop.permute.xlu1 %622 }
 0x213   : > { %v637_v53 = vadd.f32 %v623_v51, %v605_v1  ;;  %v638_v54 = vadd.f32 %v623_v51, %v606_v48  ;;  %789 = vmatprep.subr.mxu0 %v640_v50 }
 0x214   : > { %790 = vmatpush1.msra.mxu0 %v639_v49  ;;  %v685_v27 = vpop.permute.xlu0 %684 }
 0x215   : > { %791 = vmatprep.subr.mxu0 %v638_v54 }
 0x216   : > { %792 = vmatpush1.msra.mxu0 %v637_v53  ;;  %v670_v62 = vpop.permute.xlu1 %669 }
 0x217   : > { %793 = vmatprep.subr.mxu0 %v636_v4 }
 0x218   : > { %794 = vmatpush1.msra.mxu0 %v635_v55  ;;  %v700_v43 = vpop.permute.xlu0 %699 }
 0x219   : > { %2130 = vmatmul.mubr.msk.f32.vlgmr.msra.gmra.mxu0 %vm348_vm0, %v643_v15 }
 0x21a   : > { %833 = vmatprep.mubr.f32.mxu0 %v3534_v20  ;;  %v680_v19 = vpop.permute.xlu1 %679 }
 0x21c   : > { %v690_v49 = vpop.permute.xlu0 %689 }
 0x21d   : > { %2131 = vmatmul.mubr.msk.f32.gmra.mxu0 %vm348_vm0, %v644_v14 }
 0x21e   : > { %839 = vmatprep.mubr.f32.mxu0 %v3534_v20  ;;  %v705_v41 = vpop.permute.xlu1 %704 }
 0x221   : > { %2132 = vmatmul.mubr.msk.f32.gmra.mxu0 %vm348_vm0, %v645_v56 }
 0x222   : > { %845 = vmatprep.mubr.f32.mxu0 %v3534_v20  ;;  %v695_v0 = vpop.permute.xlu1 %694 }
 0x225   : > { %2133 = vmatmul.mubr.msk.f32.gmra.mxu0 %vm348_vm0, %v646_v57 }
 0x226   : > { %851 = vmatprep.mubr.f32.mxu0 %v3534_v20 }
 0x229   : > { %2134 = vmatmul.mubr.msk.f32.gmra.mxu0 %vm348_vm0, %v647_v58 }
 0x22a   : > { %857 = vmatprep.mubr.f32.mxu0 %v3534_v20 }
 0x22d   : > { %2135 = vmatmul.mubr.msk.f32.gmra.mxu0 %vm348_vm0, %v648_v59 }
 0x22e   : > { %863 = vmatprep.mubr.f32.mxu0 %v3534_v20 }
 0x231   : > { %2136 = vmatmul.mubr.msk.f32.gmra.mxu0 %vm348_vm0, %v649_v60 }
 0x232   : > { %869 = vmatprep.mubr.f32.mxu0 %v3534_v20 }
 0x235   : > { %2137 = vmatmul.mubr.msk.f32.gmra.mxu0 %vm348_vm0, %v650_v61 }
 0x236   : > { %875 = vmatprep.mubr.f32.mxu0 %v3534_v20 }
 0x2d9   : > { %v829_v63 = vpop.f32.mrf.mxu0 }
 0x2da   : > { %v830_v3 = vadd.f32 %v829_v63, %v670_v62 }
 0x2db   : > { %v831_v7 = vpop.f32.mrf.mxu0 }
 0x2dc   : > { %v900_v8 = vmul.f32 0.17677669, %v830_v3  ;;  %v832_v9 = vadd.f32 %v831_v7, %v670_v62 }
 0x2dd   : > { %v835_v11 = vpop.f32.mrf.mxu0 }
 0x2de   : > { %v901_v12 = vmul.f32 0.17677669, %v832_v9  ;;  %v836_v13 = vadd.f32 %v835_v11, %v675_v10  ;;  %908 = vxpose.xlu1.b32.start [1/4] (short) %v900_v8, 128 }
 0x2df   : > { %v837_v16 = vpop.f32.mrf.mxu0 }
 0x2e0   : > { %v902_v17 = vmul.f32 0.17677669, %v836_v13  ;;  %v838_v18 = vadd.f32 %v837_v16, %v675_v10  ;;  %940 = vxpose.xlu0.b32.start [1/4] (short) %v901_v12, 128 }
 0x2e1   : > { %v841_v21 = vpop.f32.mrf.mxu0 }
 0x2e2   : > { %v903_v22 = vmul.f32 0.17677669, %v838_v18  ;;  %v842_v23 = vadd.f32 %v841_v21, %v680_v19  ;;  %909 = vxpose.xlu1.b32.cont [2/4] (short) %v902_v17, 128 }
 0x2e3   : > { %v843_v24 = vpop.f32.mrf.mxu0 }
 0x2e4   : > { %v904_v25 = vmul.f32 0.17677669, %v842_v23  ;;  %v844_v26 = vadd.f32 %v843_v24, %v680_v19  ;;  %941 = vxpose.xlu0.b32.cont [2/4] (short) %v903_v22, 128 }
 0x2e5   : > { %v847_v28 = vpop.f32.mrf.mxu0 }
 0x2e6   : > { %v905_v29 = vmul.f32 0.17677669, %v844_v26  ;;  %v848_v30 = vadd.f32 %v847_v28, %v685_v27  ;;  %910 = vxpose.xlu1.b32.cont [3/4] (short) %v904_v25, 128 }
 0x2e7   : > { %v849_v31 = vpop.f32.mrf.mxu0 }
 0x2e8   : > { %v906_v32 = vmul.f32 0.17677669, %v848_v30  ;;  %v850_v33 = vadd.f32 %v849_v31, %v685_v27  ;;  %942 = vxpose.xlu0.b32.cont [3/4] (short) %v905_v29, 128 }
 0x2e9   : > { %v853_v34 = vpop.f32.mrf.mxu0 }
 0x2ea   : > { %v907_v35 = vmul.f32 0.17677669, %v850_v33  ;;  %911 = vxpose.xlu1.b32.end [4/4] (short) %v906_v32, 128  ;;  %v854_v6 = vadd.f32 %v853_v34, %v690_v49 }
 0x2eb   : > { %v855_v36 = vpop.f32.mrf.mxu0 }
 0x2ec   : > { %943 = vxpose.xlu0.b32.end [4/4] (short) %v907_v35, 128  ;;  %v856_v5 = vadd.f32 %v855_v36, %v690_v49 }
 0x2ed   : > { %v859_v37 = vpop.f32.mrf.mxu0 }
 0x2ee   : > { %v860_v50 = vadd.f32 %v859_v37, %v695_v0 }
 0x2ef   : > { %v861_v38 = vpop.f32.mrf.mxu0 }
 0x2f0   : > { %v862_v48 = vadd.f32 %v861_v38, %v695_v0 }
 0x2f1   : > { %v865_v39 = vpop.f32.mrf.mxu0 }
 0x2f2   : > { %v866_v1 = vadd.f32 %v865_v39, %v700_v43 }
 0x2f3   : > { %v867_v40 = vpop.f32.mrf.mxu0 }
 0x2f4   : > { %v868_v47 = vadd.f32 %v867_v40, %v700_v43 }
 0x2f5   : > { %v871_v42 = vpop.f32.mrf.mxu0 }
 0x2f6   : > { %v872_v46 = vadd.f32 %v871_v42, %v705_v41 }
 0x2f7   : > { %v873_v44 = vpop.f32.mrf.mxu0 }
 0x2f8   : > { %v874_v45 = vadd.f32 %v873_v44, %v705_v41 }
 0x2fa   : > { %1092 = vmatprep.subr.mxu1 %v874_v45 }
 0x2fb   : > { %1093 = vmatpush1.msra.mxu1 %v872_v46 }
 0x2fc   : > { %1094 = vmatprep.subr.mxu1 %v868_v47 }
 0x2fd   : > { %1095 = vmatpush1.msra.mxu1 %v866_v1 }
 0x2fe   : > { %1096 = vmatprep.subr.mxu1 %v862_v48 }
 0x2ff   : > { %1097 = vmatpush1.msra.mxu1 %v860_v50 }
 0x300   : > { %1098 = vmatprep.subr.mxu1 %v856_v5 }
 0x301   : > { %1099 = vmatpush1.msra.mxu1 %v854_v6 }
 0x35a   : > { %v924_v51 = vpop.trf.xlu1 }
 0x35b   : > { %2142 = vmatmul.mubr.msk.f32.vlgmr.msra.gmra.mxu1 %vm348_vm0, %v924_v51 }
 0x35c   : > { %1138 = vmatprep.mubr.f32.mxu1 %v3534_v20  ;;  %v956_v56 = vpop.trf.xlu0 }
 0x35e   : > { %v925_v52 = vpop.trf.xlu1 }
 0x35f   : > { %2143 = vmatmul.mubr.msk.f32.gmra.mxu1 %vm348_vm0, %v925_v52 }
 0x360   : > { %1144 = vmatprep.mubr.f32.mxu1 %v3534_v20  ;;  %v957_v58 = vpop.trf.xlu0 }
 0x362   : > { %v926_v53 = vpop.trf.xlu1 }
 0x363   : > { %2144 = vmatmul.mubr.msk.f32.gmra.mxu1 %vm348_vm0, %v926_v53 }
 0x364   : > { %1150 = vmatprep.mubr.f32.mxu1 %v3534_v20  ;;  %v958_v61 = vpop.trf.xlu0 }
 0x366   : > { %v927_v54 = vpop.trf.xlu1 }
 0x367   : > { %2145 = vmatmul.mubr.msk.f32.gmra.mxu1 %vm348_vm0, %v927_v54 }
 0x368   : > { %1156 = vmatprep.mubr.f32.mxu1 %v3534_v20  ;;  %v959_v63 = vpop.trf.xlu0 }
 0x36a   : > { %v928_v2 = vpop.trf.xlu1 }
 0x36b   : > { %2146 = vmatmul.mubr.msk.f32.gmra.mxu1 %vm348_vm0, %v928_v2 }
 0x36c   : > { %1162 = vmatprep.mubr.f32.mxu1 %v3534_v20  ;;  %v960_v8 = vpop.trf.xlu0 }
 0x36e   : > { %v929_v4 = vpop.trf.xlu1 }
 0x36f   : > { %2147 = vmatmul.mubr.msk.f32.gmra.mxu1 %vm348_vm0, %v929_v4 }
 0x370   : > { %1168 = vmatprep.mubr.f32.mxu1 %v3534_v20  ;;  %v961_v10 = vpop.trf.xlu0 }
 0x372   : > { %v930_v55 = vpop.trf.xlu1 }
 0x373   : > { %2148 = vmatmul.mubr.msk.f32.gmra.mxu1 %vm348_vm0, %v930_v55 }
 0x374   : > { %1174 = vmatprep.mubr.f32.mxu1 %v3534_v20  ;;  %v962_v11 = vpop.trf.xlu0 }
 0x376   : > { %v931_v15 = vpop.trf.xlu1 }
 0x377   : > { %2149 = vmatmul.mubr.msk.f32.gmra.mxu1 %vm348_vm0, %v931_v15 }
 0x378   : > { %1180 = vmatprep.mubr.f32.mxu1 %v3534_v20  ;;  %v963_v12 = vpop.trf.xlu0 }
 0x37a   : > { %v932_v14 = vpop.trf.xlu1 }
 0x37b   : > { %2150 = vmatmul.mubr.msk.f32.gmra.mxu1 %vm348_vm0, %v932_v14 }
 0x37c   : > { %1186 = vmatprep.mubr.f32.mxu1 %v3534_v20  ;;  %v964_v13 = vpop.trf.xlu0 }
 0x37e   : > { %v933_v57 = vpop.trf.xlu1 }
 0x37f   : > { %2151 = vmatmul.mubr.msk.f32.gmra.mxu1 %vm348_vm0, %v933_v57 }
 0x380   : > { %1192 = vmatprep.mubr.f32.mxu1 %v3534_v20  ;;  %v965_v16 = vpop.trf.xlu0 }
 0x382   : > { %v934_v59 = vpop.trf.xlu1 }
 0x383   : > { %2152 = vmatmul.mubr.msk.f32.gmra.mxu1 %vm348_vm0, %v934_v59 }
 0x384   : > { %1198 = vmatprep.mubr.f32.mxu1 %v3534_v20  ;;  %v966_v17 = vpop.trf.xlu0 }
 0x386   : > { %v935_v60 = vpop.trf.xlu1 }
 0x387   : > { %2153 = vmatmul.mubr.msk.f32.gmra.mxu1 %vm348_vm0, %v935_v60 }
 0x388   : > { %1204 = vmatprep.mubr.f32.mxu1 %v3534_v20  ;;  %v967_v18 = vpop.trf.xlu0 }
 0x38a   : > { %v936_v62 = vpop.trf.xlu1 }
 0x38b   : > { %2154 = vmatmul.mubr.msk.f32.gmra.mxu1 %vm348_vm0, %v936_v62 }
 0x38c   : > { %1210 = vmatprep.mubr.f32.mxu1 %v3534_v20  ;;  %v968_v19 = vpop.trf.xlu0 }
 0x38e   : > { %v937_v3 = vpop.trf.xlu1 }
 0x38f   : > { %2155 = vmatmul.mubr.msk.f32.gmra.mxu1 %vm348_vm0, %v937_v3 }
 0x390   : > { %1216 = vmatprep.mubr.f32.mxu1 %v3534_v20  ;;  %v969_v21 = vpop.trf.xlu0 }
 0x392   : > { %v938_v7 = vpop.trf.xlu1 }
 0x393   : > { %2156 = vmatmul.mubr.msk.f32.gmra.mxu1 %vm348_vm0, %v938_v7 }
 0x394   : > { %1222 = vmatprep.mubr.f32.mxu1 %v3534_v20  ;;  %v970_v22 = vpop.trf.xlu0 }
 0x396   : > { %v939_v9 = vpop.trf.xlu1 }
 0x397   : > { %2157 = vmatmul.mubr.msk.f32.gmra.mxu1 %vm348_vm0, %v939_v9 }
 0x398   : > { %1228 = vmatprep.mubr.f32.mxu1 %v3534_v20  ;;  %v971_v23 = vpop.trf.xlu0 }
 0x39b   : > { %2158 = vmatmul.mubr.msk.f32.gmra.mxu1 %vm348_vm0, %v956_v56 }
 0x39c   : > { %1234 = vmatprep.mubr.f32.mxu1 %v3534_v20 }
 0x39f   : > { %2159 = vmatmul.mubr.msk.f32.gmra.mxu1 %vm348_vm0, %v957_v58 }
 0x3a0   : > { %1240 = vmatprep.mubr.f32.mxu1 %v3534_v20 }
 0x3a3   : > { %2160 = vmatmul.mubr.msk.f32.gmra.mxu1 %vm348_vm0, %v958_v61 }
 0x3a4   : > { %1246 = vmatprep.mubr.f32.mxu1 %v3534_v20 }
 0x3a7   : > { %2161 = vmatmul.mubr.msk.f32.gmra.mxu1 %vm348_vm0, %v959_v63 }
 0x3a8   : > { %1252 = vmatprep.mubr.f32.mxu1 %v3534_v20 }
 0x3ab   : > { %2162 = vmatmul.mubr.msk.f32.gmra.mxu1 %vm348_vm0, %v960_v8 }
 0x3ac   : > { %1258 = vmatprep.mubr.f32.mxu1 %v3534_v20 }
 0x3af   : > { %2163 = vmatmul.mubr.msk.f32.gmra.mxu1 %vm348_vm0, %v961_v10 }
 0x3b0   : > { %1264 = vmatprep.mubr.f32.mxu1 %v3534_v20 }
 0x3b3   : > { %2164 = vmatmul.mubr.msk.f32.gmra.mxu1 %vm348_vm0, %v962_v11 }
 0x3b4   : > { %1270 = vmatprep.mubr.f32.mxu1 %v3534_v20 }
 0x3b7   : > { %2165 = vmatmul.mubr.msk.f32.gmra.mxu1 %vm348_vm0, %v963_v12 }
 0x3b8   : > { %1276 = vmatprep.mubr.f32.mxu1 %v3534_v20 }
 0x3bb   : > { %2166 = vmatmul.mubr.msk.f32.gmra.mxu1 %vm348_vm0, %v964_v13 }
 0x3bc   : > { %1282 = vmatprep.mubr.f32.mxu1 %v3534_v20 }
 0x3bf   : > { %2167 = vmatmul.mubr.msk.f32.gmra.mxu1 %vm348_vm0, %v965_v16 }
 0x3c0   : > { %1288 = vmatprep.mubr.f32.mxu1 %v3534_v20 }
 0x3c3   : > { %2168 = vmatmul.mubr.msk.f32.gmra.mxu1 %vm348_vm0, %v966_v17 }
 0x3c4   : > { %1294 = vmatprep.mubr.f32.mxu1 %v3534_v20 }
 0x3c7   : > { %2169 = vmatmul.mubr.msk.f32.gmra.mxu1 %vm348_vm0, %v967_v18 }
 0x3c8   : > { %1300 = vmatprep.mubr.f32.mxu1 %v3534_v20 }
 0x3cb   : > { %2170 = vmatmul.mubr.msk.f32.gmra.mxu1 %vm348_vm0, %v968_v19 }
 0x3cc   : > { %1306 = vmatprep.mubr.f32.mxu1 %v3534_v20 }
 0x3cf   : > { %2171 = vmatmul.mubr.msk.f32.gmra.mxu1 %vm348_vm0, %v969_v21 }
 0x3d0   : > { %1312 = vmatprep.mubr.f32.mxu1 %v3534_v20 }
 0x3d3   : > { %2172 = vmatmul.mubr.msk.f32.gmra.mxu1 %vm348_vm0, %v970_v22 }
 0x3d4   : > { %1318 = vmatprep.mubr.f32.mxu1 %v3534_v20 }
 0x3d7   : > { %2173 = vmatmul.mubr.msk.f32.gmra.mxu1 %vm348_vm0, %v971_v23 }
 0x3d8   : > { %1998 = vmatprep.mubr.f32.mxu1 %v3534_v20 }
 0x41b   : > { %v2879_v24 = vpop.f32.mrf.mxu1 }
 0x41c   : > { %3564 = vst [vmem:[#allocation5_spill] sm:$0xff] %v2879_v24 }
 0x41d   : > { %v2881_v25 = vpop.f32.mrf.mxu1 }
 0x41e   : > { %3565 = vst [vmem:[#allocation6_spill] sm:$0xff] %v2881_v25  ;;  %v1325_v17 = vmax.f32 %v2879_v24, %v2881_v25 }
 0x41f   : > { %v2883_v26 = vpop.f32.mrf.mxu1 }
 0x421   : > { %v2885_v27 = vpop.f32.mrf.mxu1 }
 0x422   : > { %v1328_v22 = vmax.f32 %v2883_v26, %v2885_v27 }
 0x423   : > { %v2887_v28 = vpop.f32.mrf.mxu1 }
 0x424   : > { %3566 = vst [vmem:[#allocation7_spill] sm:$0xff] %v2887_v28 }
 0x425   : > { %v2889_v29 = vpop.f32.mrf.mxu1 }
 0x426   : > { %3567 = vst [vmem:[#allocation8_spill] sm:$0xff] %v2889_v29  ;;  %v1331_v11 = vmax.f32 %v2887_v28, %v2889_v29 }
 0x427   : > { %v2891_v30 = vpop.f32.mrf.mxu1 }
 0x429   : > { %v2893_v31 = vpop.f32.mrf.mxu1 }
 0x42a   : > { %v1334_v18 = vmax.f32 %v2891_v30, %v2893_v31 }
 0x42b   : > { %v2895_v32 = vpop.f32.mrf.mxu1 }
 0x42d   : > { %v2897_v33 = vpop.f32.mrf.mxu1 }
 0x42e   : > { %3568 = vst [vmem:[#allocation9_spill] sm:$0xff] %v2897_v33  ;;  %v1337_v7 = vmax.f32 %v2895_v32, %v2897_v33 }
 0x42f   : > { %v2899_v34 = vpop.f32.mrf.mxu1 }
 0x431   : > { %v2901_v35 = vpop.f32.mrf.mxu1 }
 0x432   : > { %v1340_v12 = vmax.f32 %v2899_v34, %v2901_v35 }
 0x433   : > { %v2903_v36 = vpop.f32.mrf.mxu1 }
 0x435   : > { %v2905_v37 = vpop.f32.mrf.mxu1 }
 0x436   : > { %v1343_v61 = vmax.f32 %v2903_v36, %v2905_v37 }
 0x437   : > { %v2907_v38 = vpop.f32.mrf.mxu1 }
 0x439   : > { %v2909_v39 = vpop.f32.mrf.mxu1 }
 0x43a   : > { %v1346_v8 = vmax.f32 %v2907_v38, %v2909_v39 }
 0x43b   : > { %v2911_v40 = vpop.f32.mrf.mxu1 }
 0x43d   : > { %v2913_v41 = vpop.f32.mrf.mxu1 }
 0x43e   : > { %v1349_v57 = vmax.f32 %v2911_v40, %v2913_v41 }
 0x43f   : > { %v2915_v42 = vpop.f32.mrf.mxu1 }
 0x441   : > { %v2917_v43 = vpop.f32.mrf.mxu1 }
 0x442   : > { %v1352_v62 = vmax.f32 %v2915_v42, %v2917_v43 }
 0x443   : > { %v2919_v44 = vpop.f32.mrf.mxu1 }
 0x445   : > { %v2921_v45 = vpop.f32.mrf.mxu1 }
 0x446   : > { %v1355_v55 = vmax.f32 %v2919_v44, %v2921_v45 }
 0x447   : > { %v2923_v46 = vpop.f32.mrf.mxu1 }
 0x449   : > { %v2925_v47 = vpop.f32.mrf.mxu1 }
 0x44a   : > { %v1358_v58 = vmax.f32 %v2923_v46, %v2925_v47 }
 0x44b   : > { %v2927_v0 = vpop.f32.mrf.mxu1 }
 0x44d   : > { %v2929_v1 = vpop.f32.mrf.mxu1 }
 0x44e   : > { %v1361_v53 = vmax.f32 %v2927_v0, %v2929_v1 }
 0x44f   : > { %v2931_v48 = vpop.f32.mrf.mxu1 }
 0x451   : > { %v2933_v49 = vpop.f32.mrf.mxu1 }
 0x452   : > { %v1364_v15 = vmax.f32 %v2931_v48, %v2933_v49 }
 0x453   : > { %v2935_v50 = vpop.f32.mrf.mxu1 }
 0x455   : > { %v2937_v5 = vpop.f32.mrf.mxu1 }
 0x456   : > { %v1367_v6 = vmax.f32 %v2935_v50, %v2937_v5 }
 0x457   : > { %v2941_v51 = vpop.f32.mrf.mxu1 }
 0x458   : > { %1368 = vmax.xlane.f32.xlu1 %v1367_v6 }
 0x459   : > { %v2943_v52 = vpop.f32.mrf.mxu1 }
 0x45a   : > { %v1370_v54 = vmax.f32 %v2941_v51, %v2943_v52 }
 0x45b   : > { %v2949_v2 = vpop.f32.mrf.mxu1 }
 0x45c   : > { %1362 = vmax.xlane.f32.xlu1 %v1361_v53  ;;  %1371 = vmax.xlane.f32.xlu0 %v1370_v54 }
 0x45d   : > { %v2951_v4 = vpop.f32.mrf.mxu1 }
 0x45e   : > { %3569 = vst [vmem:[#allocation10_spill] sm:$0xff] %v2951_v4 }
 0x45f   : > { %v2957_v14 = vpop.f32.mrf.mxu1 }
 0x460   : > { %1356 = vmax.xlane.f32.xlu1 %v1355_v55  ;;  %1365 = vmax.xlane.f32.xlu0 %v1364_v15 }
 0x461   : > { %v2959_v56 = vpop.f32.mrf.mxu1 }
 0x462   : > { %3570 = vst [vmem:[#allocation11_spill] sm:$0xff] %v2959_v56 }
 0x463   : > { %v2965_v59 = vpop.f32.mrf.mxu1 }
 0x464   : > { %3571 = vst [vmem:[#allocation12_spill] sm:$0xff] %v2965_v59  ;;  %1350 = vmax.xlane.f32.xlu1 %v1349_v57  ;;  %1359 = vmax.xlane.f32.xlu0 %v1358_v58 }
 0x465   : > { %v2967_v60 = vpop.f32.mrf.mxu1 }
 0x466   : > { %3572 = vst [vmem:[#allocation13_spill] sm:$0xff] %v2967_v60 }
 0x467   : > { %v2973_v63 = vpop.f32.mrf.mxu1 }
 0x468   : > { %3573 = vst [vmem:[#allocation14_spill] sm:$0xff] %v2973_v63  ;;  %1344 = vmax.xlane.f32.xlu1 %v1343_v61  ;;  %1353 = vmax.xlane.f32.xlu0 %v1352_v62 }
 0x469   : > { %v2975_v3 = vpop.f32.mrf.mxu1 }
 0x46a   : > { %3574 = vst [vmem:[#allocation15_spill] sm:$0xff] %v2975_v3 }
 0x46b   : > { %v2981_v9 = vpop.f32.mrf.mxu1 }
 0x46c   : > { %3575 = vst [vmem:[#allocation16_spill] sm:$0xff] %v2981_v9  ;;  %1338 = vmax.xlane.f32.xlu1 %v1337_v7  ;;  %1347 = vmax.xlane.f32.xlu0 %v1346_v8 }
 0x46d   : > { %v2983_v10 = vpop.f32.mrf.mxu1 }
 0x46e   : > { %3576 = vst [vmem:[#allocation17_spill] sm:$0xff] %v2983_v10 }
 0x46f   : > { %v2989_v13 = vpop.f32.mrf.mxu1 }
 0x470   : > { %1332 = vmax.xlane.f32.xlu1 %v1331_v11  ;;  %1341 = vmax.xlane.f32.xlu0 %v1340_v12 }
 0x471   : > { %v2991_v16 = vpop.f32.mrf.mxu1 }
 0x473   : > { %v2997_v19 = vpop.f32.mrf.mxu1 }
 0x474   : > { %1326 = vmax.xlane.f32.xlu1 %v1325_v17  ;;  %1335 = vmax.xlane.f32.xlu0 %v1334_v18 }
 0x475   : > { %v2999_v21 = vpop.f32.mrf.mxu1 }
 0x477   : > { %v3003_v23 = vpop.f32.mrf.mxu1 }
 0x478   : > { %1329 = vmax.xlane.f32.xlu0 %v1328_v22 }
 0x479   : > { %v3005_v6 = vpop.f32.mrf.mxu1 }
 0x47b   : > { %v3007_v53 = vpop.f32.mrf.mxu1 }
 0x47d   : > { %v3009_v54 = vpop.f32.mrf.mxu1 }
 0x47f   : > { %v3011_v55 = vpop.f32.mrf.mxu1 }
 0x481   : > { %v3013_v15 = vpop.f32.mrf.mxu1 }
 0x483   : > { %v3015_v57 = vpop.f32.mrf.mxu1 }
 0x485   : > { %v3017_v58 = vpop.f32.mrf.mxu1 }
 0x486   : > { %v1403_v28 = vmax.f32 %v3015_v57, %v3017_v58 }
 0x487   : > { %v3019_v61 = vpop.f32.mrf.mxu1 }
 0x489   : > { %v3021_v62 = vpop.f32.mrf.mxu1 }
 0x48b   : > { %v3023_v7 = vpop.f32.mrf.mxu1 }
 0x48d   : > { %v3025_v8 = vpop.f32.mrf.mxu1 }
 0x48e   : > { %3577 = vst [vmem:[#allocation18_spill] sm:$0xff] %v3025_v8  ;;  %v1409_v24 = vmax.f32 %v3023_v7, %v3025_v8  ;;  %v1400_v8 = vmax.f32 %v3011_v55, %v3013_v15 }
 0x48f   : > { %v3027_v11 = vpop.f32.mrf.mxu1 }
 0x491   : > { %v3029_v12 = vpop.f32.mrf.mxu1 }
 0x492   : > { %v1412_v33 = vmax.f32 %v3027_v11, %v3029_v12 }
 0x493   : > { %v3031_v17 = vpop.f32.mrf.mxu1 }
 0x495   : > { %v3033_v18 = vpop.f32.mrf.mxu1 }
 0x496   : > { %v1415_v22 = vmax.f32 %v3031_v17, %v3033_v18 }
 0x497   : > { %v3037_v20 = vpop.f32.mrf.mxu1 }
 0x498   : > { %1416 = vmax.xlane.f32.xlu1 %v1415_v22  ;;  %v1406_v22 = vmax.f32 %v3019_v61, %v3021_v62 }
 0x499   : > { %v3039_v25 = vpop.f32.mrf.mxu1 }
 0x49a   : > { %v1418_v29 = vmax.f32 %v3037_v20, %v3039_v25 }
 0x49c   : > { %1410 = vmax.xlane.f32.xlu1 %v1409_v24  ;;  %1419 = vmax.xlane.f32.xlu0 %v1418_v29  ;;  %v1397_v24 = vmax.f32 %v3007_v53, %v3009_v54  ;;  %v1394_v29 = vmax.f32 %v3003_v23, %v3005_v6 }
 0x4a0   : > { %1404 = vmax.xlane.f32.xlu1 %v1403_v28  ;;  %1413 = vmax.xlane.f32.xlu0 %v1412_v33  ;;  %v651_v28 = vld [vmem:[%s3529_s4 + $0x40] sm:$0xff]  ;;  %v3578_v33 = vmov 0.0  }
 0x4a1   : > { %2138 = vmatmul.mubr.msk.f32.gmra.mxu0 %vm348_vm0, %v651_v28  ;;  %v1385_v28 = vmax.f32 %v2981_v9, %v2983_v10 }
 0x4a2   : > { %881 = vmatprep.mubr.f32.mxu0 %v3578_v33 }
 0x4a4   : > { %1407 = vmax.xlane.f32.xlu0 %v1406_v22  ;;  %v1391_v22 = vmax.f32 %v2997_v19, %v2999_v21 }
 0x4a8   : > { %1401 = vmax.xlane.f32.xlu0 %v1400_v8  ;;  %v652_v8 = vld [vmem:[%s3529_s4 + $0x48] sm:$0xff] }
 0x4a9   : > { %2139 = vmatmul.mubr.msk.f32.gmra.mxu0 %vm348_vm0, %v652_v8  ;;  %v1382_v8 = vmax.f32 %v2973_v63, %v2975_v3 }
 0x4aa   : > { %887 = vmatprep.mubr.f32.mxu0 %v3578_v33 }
 0x4ac   : > { %1398 = vmax.xlane.f32.xlu0 %v1397_v24  ;;  %v1388_v24 = vmax.f32 %v2989_v13, %v2991_v16 }
 0x4b0   : > { %1395 = vmax.xlane.f32.xlu0 %v1394_v29  ;;  %v653_v29 = vld [vmem:[%s3529_s4 + $0x50] sm:$0xff] }
 0x4b1   : > { %2140 = vmatmul.mubr.msk.f32.gmra.mxu0 %vm348_vm0, %v653_v29  ;;  %v1376_v29 = vmax.f32 %v2957_v14, %v2959_v56 }
 0x4b2   : > { %893 = vmatprep.mubr.f32.mxu0 %v3578_v33  ;;  %v1373_v33 = vmax.f32 %v2949_v2, %v2951_v4 }
 0x4b4   : > { %1392 = vmax.xlane.f32.xlu0 %v1391_v22  ;;  %v654_v22 = vld [vmem:[%s3529_s4 + $0x58] sm:$0xff] }
 0x4b5   : > { %2141 = vmatmul.mubr.msk.f32.gmra.mxu0 %vm348_vm0, %v654_v22 }
 0x4b8   : > { %1389 = vmax.xlane.f32.xlu0 %v1388_v24  ;;  %v1379_v24 = vmax.f32 %v2965_v59, %v2967_v60 }
 0x4bc   : > { %1386 = vmax.xlane.f32.xlu0 %v1385_v28 }
 0x4c0   : > { %1383 = vmax.xlane.f32.xlu0 %v1382_v8 }
 0x4c4   : > { %1380 = vmax.xlane.f32.xlu0 %v1379_v24 }
 0x4c8   : > { %1377 = vmax.xlane.f32.xlu0 %v1376_v29 }
 0x4cc   : > { %1374 = vmax.xlane.f32.xlu0 %v1373_v33 }
 0x4e1   : > { %v1369_v10 = vpop.xlane.xlu1 %1368 }
 0x4e2   : > { %v1449_v28 = vsub.f32 %v2935_v50, %v1369_v10  ;;  %v1450_v22 = vsub.f32 %v2937_v5, %v1369_v10 }
 0x4e4   : > { %v1541_v60 = vmul.f32 1.442695, %v1449_v28  ;;  %v1543_v63 = vmul.f32 1.442695, %v1450_v22 }
 0x4e5   : > { %v1372_v9 = vpop.xlane.xlu0 %1371  ;;  %v1363_v56 = vpop.xlane.xlu1 %1362 }
 0x4e6   : > { %v1451_v8 = vsub.f32 %v2941_v51, %v1372_v9  ;;  %v1452_v3 = vsub.f32 %v2943_v52, %v1372_v9  ;;  %v1445_v50 = vsub.f32 %v2927_v0, %v1363_v56  ;;  %v1446_v51 = vsub.f32 %v2929_v1, %v1363_v56 }
 0x4e8   : > { %v1545_v24 = vmul.f32 1.442695, %v1451_v8  ;;  %v1547_v59 = vmul.f32 1.442695, %v1452_v3  ;;  %v1533_v3 = vmul.f32 1.442695, %v1445_v50 }
 0x4e9   : > { %v1366_v29 = vpop.xlane.xlu0 %1365  ;;  %v1357_v10 = vpop.xlane.xlu1 %1356  ;;  %v1535_v22 = vmul.f32 1.442695, %v1446_v51 }
 0x4ea   : > { %2282 = vpow2.f32 %v1545_v24  ;;  %v1447_v4 = vsub.f32 %v2931_v48, %v1366_v29  ;;  %v1448_v33 = vsub.f32 %v2933_v49, %v1366_v29 }
 0x4eb   : > { %2284 = vpow2.f32 %v1547_v59  ;;  %v1441_v59 = vsub.f32 %v2919_v44, %v1357_v10 }
 0x4ec   : > { %2286 = vpow2.f32 %v1541_v60  ;;  %v1537_v5 = vmul.f32 1.442695, %v1447_v4  ;;  %v1539_v52 = vmul.f32 1.442695, %v1448_v33  ;;  %v1442_v4 = vsub.f32 %v2921_v45, %v1357_v10 }
 0x4ed   : > { %2288 = vpow2.f32 %v1543_v63  ;;  %v1360_v9 = vpop.xlane.xlu0 %1359  ;;  %v1351_v56 = vpop.xlane.xlu1 %1350 }
 0x4ee   : > { %2290 = vpow2.f32 %v1537_v5  ;;  %v1443_v28 = vsub.f32 %v2923_v46, %v1360_v9  ;;  %v1444_v48 = vsub.f32 %v2925_v47, %v1360_v9  ;;  %v1525_v46 = vmul.f32 1.442695, %v1441_v59 }
 0x4ef   : > { %2292 = vpow2.f32 %v1539_v52  ;;  %v1527_v29 = vmul.f32 1.442695, %v1442_v4  ;;  %v1437_v52 = vsub.f32 %v2911_v40, %v1351_v56 }
 0x4f0   : > { %2294 = vpow2.f32 %v1533_v3  ;;  %v1529_v0 = vmul.f32 1.442695, %v1443_v28  ;;  %v1531_v1 = vmul.f32 1.442695, %v1444_v48 }
 0x4f1   : > { %v1354_v49 = vpop.xlane.xlu0 %1353  ;;  %2296 = vpow2.f32 %v1535_v22  ;;  %v1345_v9 = vpop.xlane.xlu1 %1344  ;;  %v1517_v59 = vmul.f32 1.442695, %v1437_v52 }
 0x4f2   : > { %2298 = vpow2.f32 %v1529_v0  ;;  %v1439_v24 = vsub.f32 %v2915_v42, %v1354_v49  ;;  %v1440_v44 = vsub.f32 %v2917_v43, %v1354_v49  ;;  %v1438_v43 = vsub.f32 %v2913_v41, %v1351_v56 }
 0x4f3   : > { %2300 = vpow2.f32 %v1531_v1 }
 0x4f4   : > { %2302 = vpow2.f32 %v1525_v46  ;;  %v1521_v42 = vmul.f32 1.442695, %v1439_v24  ;;  %v1523_v22 = vmul.f32 1.442695, %v1440_v44  ;;  %v1519_v56 = vmul.f32 1.442695, %v1438_v43 }
 0x4f5   : > { %v1348_v60 = vpop.xlane.xlu0 %1347  ;;  %2304 = vpow2.f32 %v1527_v29  ;;  %v1339_v24 = vpop.xlane.xlu1 %1338 }
 0x4f6   : > { %v1435_v0 = vsub.f32 %v2907_v38, %v1348_v60  ;;  %v1436_v46 = vsub.f32 %v2909_v39, %v1348_v60 }
 0x4f7   : > { %v3102_v63 = vpop.eup %2282 }
 0x4f8   : > { %v3104_v8 = vpop.eup %2284  ;;  %v1515_v52 = vmul.f32 1.442695, %v1436_v46 }
 0x4f9   : > { %v3107_v47 = vpop.eup %2286  ;;  %v1342_v33 = vpop.xlane.xlu0 %1341  ;;  %v1658_v45 = vadd.f32 %v3104_v8, %v3102_v63 }
 0x4fa   : > { %v3112_v50 = vpop.eup %2288  ;;  %v1431_v5 = vsub.f32 %v2899_v34, %v1342_v33  ;;  %v1432_v51 = vsub.f32 %v2901_v35, %v1342_v33  ;;  %v1433_v33 = vsub.f32 %v2903_v36, %v1345_v9  ;;  %v1333_v36 = vpop.xlane.xlu1 %1332 }
 0x4fb   : > { %1659 = vadd.xlane.f32.xlu1 %v1658_v45  ;;  %v3117_v28 = vpop.eup %2290  ;;  %v1655_v34 = vadd.f32 %v3112_v50, %v3107_v47  ;;  %v1513_v45 = vmul.f32 1.442695, %v1435_v0 }
 0x4fc   : > { %v1505_v10 = vmul.f32 1.442695, %v1431_v5  ;;  %v1507_v3 = vmul.f32 1.442695, %v1432_v51  ;;  %v3122_v49 = vpop.eup %2292  ;;  %v1434_v51 = vsub.f32 %v2905_v37, %v1345_v9 }
 0x4fd   : > { %v1336_v48 = vpop.xlane.xlu0 %1335  ;;  %v3127_v1 = vpop.eup %2294 }
 0x4fe   : > { %2306 = vpow2.f32 %v1505_v10  ;;  %v1427_v35 = vsub.f32 %v2891_v30, %v1336_v48  ;;  %v1428_v40 = vsub.f32 %v2893_v31, %v1336_v48  ;;  %v1652_v30 = vadd.f32 %v3122_v49, %v3117_v28  ;;  %v3132_v31 = vpop.eup %2296  ;;  %v1327_v46 = vpop.xlane.xlu1 %1326 }
 0x4ff   : > { %2308 = vpow2.f32 %v1507_v3  ;;  %1656 = vadd.xlane.f32.xlu1 %v1655_v34  ;;  %v3137_v60 = vpop.eup %2298  ;;  %v1509_v10 = vmul.f32 1.442695, %v1433_v33  ;;  %v3579_v3 = vld [vmem:[#allocation9_spill] sm:$0xff]  ;;  %v1511_v48 = vmul.f32 1.442695, %v1434_v51 }
 0x500   : > { %2310 = vpow2.f32 %v1521_v42  ;;  %v1497_v4 = vmul.f32 1.442695, %v1427_v35  ;;  %v1499_v41 = vmul.f32 1.442695, %v1428_v40  ;;  %v1649_v42 = vadd.f32 %v3132_v31, %v3127_v1 }
 0x501   : > { %2312 = vpow2.f32 %v1523_v22  ;;  %v1330_v29 = vpop.xlane.xlu0 %1329  ;;  %v1430_v43 = vsub.f32 %v3579_v3, %v1339_v24 }
 0x502   : > { %2314 = vpow2.f32 %v1497_v4  ;;  %v1423_v44 = vsub.f32 %v2883_v26, %v1330_v29  ;;  %v1424_v38 = vsub.f32 %v2885_v27, %v1330_v29  ;;  %v3142_v26 = vpop.eup %2300  ;;  %v1429_v27 = vsub.f32 %v2895_v32, %v1339_v24 }
 0x503   : > { %2316 = vpow2.f32 %v1499_v41  ;;  %1653 = vadd.xlane.f32.xlu1 %v1652_v30  ;;  %v3146_v22 = vpop.eup %2302  ;;  %v1646_v37 = vadd.f32 %v3142_v26, %v3137_v60  ;;  %v1503_v40 = vmul.f32 1.442695, %v1430_v43  ;;  %v3581_v41 = vld [vmem:[#allocation8_spill] sm:$0xff] }
 0x504   : > { %2318 = vpow2.f32 %v1517_v59  ;;  %v1489_v5 = vmul.f32 1.442695, %v1423_v44  ;;  %v1491_v39 = vmul.f32 1.442695, %v1424_v38  ;;  %v3150_v9 = vpop.eup %2304  ;;  %v1501_v35 = vmul.f32 1.442695, %v1429_v27 }
 0x505   : > { %2320 = vpow2.f32 %v1519_v56  ;;  %v3580_v59 = vld [vmem:[#allocation7_spill] sm:$0xff]  ;;  %v1426_v56 = vsub.f32 %v3581_v41, %v1333_v36  ;;  %v1643_v29 = vadd.f32 %v3150_v9, %v3146_v22 }
 0x506   : > { %2322 = vpow2.f32 %v1489_v5  ;;  %v1425_v0 = vsub.f32 %v3580_v59, %v1333_v36 }
 0x507   : > { %2324 = vpow2.f32 %v1491_v39  ;;  %1650 = vadd.xlane.f32.xlu1 %v1649_v42  ;;  %v1495_v51 = vmul.f32 1.442695, %v1426_v56 }
 0x508   : > { %2326 = vpow2.f32 %v1513_v45  ;;  %v1493_v33 = vmul.f32 1.442695, %v1425_v0  ;;  %v3584_v45 = vld [vmem:[#allocation5_spill] sm:$0xff] }
 0x509   : > { %2328 = vpow2.f32 %v1515_v52  ;;  %v1421_v5 = vsub.f32 %v3584_v45, %v1327_v46  ;;  %v3585_v52 = vld [vmem:[#allocation6_spill] sm:$0xff] }
 0x50a   : > { %2330 = vpow2.f32 %v1509_v10  ;;  %v1422_v42 = vsub.f32 %v3585_v52, %v1327_v46 }
 0x50b   : > { %v3152_v34 = vpop.eup %2306  ;;  %1647 = vadd.xlane.f32.xlu1 %v1646_v37  ;;  %2332 = vpow2.f32 %v1511_v48  ;;  %v1485_v48 = vmul.f32 1.442695, %v1421_v5 }
 0x50c   : > { %v3154_v32 = vpop.eup %2308  ;;  %2334 = vpow2.f32 %v1501_v35  ;;  %v1487_v35 = vmul.f32 1.442695, %v1422_v42 }
 0x50d   : > { %v3157_v4 = vpop.eup %2310  ;;  %v1628_v24 = vadd.f32 %v3154_v32, %v3152_v34  ;;  %2336 = vpow2.f32 %v1503_v40 }
 0x50e   : > { %v3164_v30 = vpop.eup %2312  ;;  %2338 = vpow2.f32 %v1493_v33 }
 0x50f   : > { %v3166_v44 = vpop.eup %2314  ;;  %1629 = vadd.xlane.f32.xlu0 %v1628_v24  ;;  %1644 = vadd.xlane.f32.xlu1 %v1643_v29  ;;  %v1640_v36 = vadd.f32 %v3164_v30, %v3157_v4  ;;  %2340 = vpow2.f32 %v1495_v51 }
 0x510   : > { %3582 = vst [vmem:[#allocation9_spill] sm:$0xff] %v3166_v44  ;;  %v3168_v38 = vpop.eup %2316  ;;  %2342 = vpow2.f32 %v1485_v48 }
 0x511   : > { %3583 = vst [vmem:[#allocation7_spill] sm:$0xff] %v3168_v38  ;;  %v3171_v39 = vpop.eup %2318  ;;  %v1622_v27 = vadd.f32 %v3168_v38, %v3166_v44  ;;  %2344 = vpow2.f32 %v1487_v35 }
 0x512   : > { %v3178_v10 = vpop.eup %2320 }
 0x513   : > { %v3180_v3 = vpop.eup %2322  ;;  %1623 = vadd.xlane.f32.xlu0 %v1622_v27  ;;  %1641 = vadd.xlane.f32.xlu1 %v1640_v36  ;;  %v1637_v59 = vadd.f32 %v3178_v10, %v3171_v39 }
 0x514   : > { %3586 = vst [vmem:[#allocation8_spill] sm:$0xff] %v3180_v3  ;;  %v3182_v43 = vpop.eup %2324 }
 0x515   : > { %3587 = vst [vmem:[#allocation5_spill] sm:$0xff] %v3182_v43  ;;  %v3184_v37 = vpop.eup %2326  ;;  %v1616_v40 = vadd.f32 %v3182_v43, %v3180_v3 }
 0x516   : > { %v3190_v0 = vpop.eup %2328 }
 0x517   : > { %1617 = vadd.xlane.f32.xlu0 %v1616_v40  ;;  %1638 = vadd.xlane.f32.xlu1 %v1637_v59  ;;  %v3192_v41 = vpop.eup %2330  ;;  %v1634_v56 = vadd.f32 %v3190_v0, %v3184_v37 }
 0x518   : > { %v3196_v46 = vpop.eup %2332 }
 0x519   : > { %v3198_v24 = vpop.eup %2334  ;;  %v1631_v33 = vadd.f32 %v3196_v46, %v3192_v41 }
 0x51a   : > { %3588 = vst [vmem:[#allocation6_spill] sm:$0xff] %v3198_v24  ;;  %v3200_v29 = vpop.eup %2336 }
 0x51b   : > { %1635 = vadd.xlane.f32.xlu1 %v1634_v56  ;;  %v3204_v45 = vpop.eup %2338  ;;  %v1625_v51 = vadd.f32 %v3200_v29, %v3198_v24 }
 0x51c   : > { %3589 = vst [vmem:[#allocation19_spill] sm:$0xff] %v3204_v45  ;;  %v3208_v52 = vpop.eup %2340 }
 0x51d   : > { %v3212_v35 = vpop.eup %2342  ;;  %v1619_v56 = vadd.f32 %v3208_v52, %v3204_v45 }
 0x51f   : > { %1632 = vadd.xlane.f32.xlu1 %v1631_v33  ;;  %v3216_v33 = vpop.eup %2344 }
 0x520   : > { %v1613_v45 = vadd.f32 %v3216_v33, %v3212_v35 }
 0x521   : > { %v1417_v5 = vpop.xlane.xlu1 %1416 }
 0x522   : > { %v1481_v42 = vsub.f32 %v3031_v17, %v1417_v5  ;;  %v1482_v27 = vsub.f32 %v3033_v18, %v1417_v5  ;;  %v3590_v18 = vld [vmem:[#allocation18_spill] sm:$0xff] }
 0x523   : > { %1626 = vadd.xlane.f32.xlu1 %v1625_v51 }
 0x524   : > { %v1605_v36 = vmul.f32 1.442695, %v1481_v42  ;;  %v1607_v48 = vmul.f32 1.442695, %v1482_v27 }
 0x525   : > { %v1420_v40 = vpop.xlane.xlu0 %1419  ;;  %v1411_v59 = vpop.xlane.xlu1 %1410 }
 0x526   : > { %2346 = vpow2.f32 %v1605_v36  ;;  %v1483_v3 = vsub.f32 %v3037_v20, %v1420_v40  ;;  %v1484_v43 = vsub.f32 %v3039_v25, %v1420_v40  ;;  %v1477_v17 = vsub.f32 %v3023_v7, %v1411_v59 }
 0x527   : > { %2348 = vpow2.f32 %v1607_v48  ;;  %v1478_v5 = vsub.f32 %v3590_v18, %v1411_v59  ;;  %1620 = vadd.xlane.f32.xlu1 %v1619_v56 }
 0x528   : > { %v1609_v51 = vmul.f32 1.442695, %v1483_v3  ;;  %v1611_v42 = vmul.f32 1.442695, %v1484_v43  ;;  %v1597_v27 = vmul.f32 1.442695, %v1477_v17 }
 0x529   : > { %v1599_v44 = vmul.f32 1.442695, %v1478_v5  ;;  %v1414_v38 = vpop.xlane.xlu0 %1413  ;;  %v1405_v24 = vpop.xlane.xlu1 %1404 }
 0x52a   : > { %2350 = vpow2.f32 %v1609_v51  ;;  %v1479_v20 = vsub.f32 %v3027_v11, %v1414_v38  ;;  %v1480_v25 = vsub.f32 %v3029_v12, %v1414_v38  ;;  %v1473_v7 = vsub.f32 %v3015_v57, %v1405_v24 }
 0x52b   : > { %2352 = vpow2.f32 %v1611_v42  ;;  %v1474_v36 = vsub.f32 %v3017_v58, %v1405_v24  ;;  %1614 = vadd.xlane.f32.xlu1 %v1613_v45 }
 0x52c   : > { %2354 = vpow2.f32 %v1597_v27  ;;  %v1601_v3 = vmul.f32 1.442695, %v1479_v20  ;;  %v1603_v43 = vmul.f32 1.442695, %v1480_v25  ;;  %v1589_v48 = vmul.f32 1.442695, %v1473_v7 }
 0x52d   : > { %2356 = vpow2.f32 %v1599_v44  ;;  %v1591_v40 = vmul.f32 1.442695, %v1474_v36  ;;  %v1408_v59 = vpop.xlane.xlu0 %1407 }
 0x52e   : > { %2358 = vpow2.f32 %v1601_v3  ;;  %v1475_v56 = vsub.f32 %v3019_v61, %v1408_v59  ;;  %v1476_v11 = vsub.f32 %v3021_v62, %v1408_v59 }
 0x52f   : > { %2360 = vpow2.f32 %v1603_v43 }
 0x530   : > { %2362 = vpow2.f32 %v1589_v48  ;;  %v1593_v12 = vmul.f32 1.442695, %v1475_v56  ;;  %v1595_v57 = vmul.f32 1.442695, %v1476_v11 }
 0x531   : > { %2364 = vpow2.f32 %v1591_v40  ;;  %v1402_v38 = vpop.xlane.xlu0 %1401 }
 0x532   : > { %2366 = vpow2.f32 %v1593_v12  ;;  %v1471_v58 = vsub.f32 %v3011_v55, %v1402_v38  ;;  %v1472_v24 = vsub.f32 %v3013_v15, %v1402_v38 }
 0x533   : > { %v3232_v45 = vpop.eup %2346  ;;  %2368 = vpow2.f32 %v1595_v57 }
 0x534   : > { %v3234_v44 = vpop.eup %2348  ;;  %v1585_v17 = vmul.f32 1.442695, %v1471_v58  ;;  %v1587_v61 = vmul.f32 1.442695, %v1472_v24 }
 0x535   : > { %v1399_v18 = vpop.xlane.xlu0 %1398  ;;  %v1703_v62 = vadd.f32 %v3234_v44, %v3232_v45 }
 0x536   : > { %2370 = vpow2.f32 %v1585_v17  ;;  %v1469_v5 = vsub.f32 %v3007_v53, %v1399_v18  ;;  %v1470_v51 = vsub.f32 %v3009_v54, %v1399_v18 }
 0x537   : > { %v3240_v42 = vpop.eup %2350  ;;  %2372 = vpow2.f32 %v1587_v61  ;;  %1704 = vadd.xlane.f32.xlu1 %v1703_v62 }
 0x538   : > { %v3242_v55 = vpop.eup %2352  ;;  %v1581_v15 = vmul.f32 1.442695, %v1469_v5  ;;  %v1583_v27 = vmul.f32 1.442695, %v1470_v51 }
 0x539   : > { %v3244_v20 = vpop.eup %2354  ;;  %v1396_v25 = vpop.xlane.xlu0 %1395  ;;  %v1706_v7 = vadd.f32 %v3242_v55, %v3240_v42 }
 0x53a   : > { %v3248_v36 = vpop.eup %2356  ;;  %2374 = vpow2.f32 %v1581_v15  ;;  %v1467_v53 = vsub.f32 %v3003_v23, %v1396_v25  ;;  %v1468_v54 = vsub.f32 %v3005_v6, %v1396_v25 }
 0x53b   : > { %v3252_v3 = vpop.eup %2358  ;;  %2376 = vpow2.f32 %v1583_v27  ;;  %1707 = vadd.xlane.f32.xlu0 %v1706_v7  ;;  %v1697_v43 = vadd.f32 %v3248_v36, %v3244_v20 }
 0x53c   : > { %v3256_v48 = vpop.eup %2360  ;;  %v1577_v40 = vmul.f32 1.442695, %v1467_v53  ;;  %v1579_v59 = vmul.f32 1.442695, %v1468_v54  ;;  %v3591_v53 = vld [vmem:[#allocation16_spill] sm:$0xff] }
 0x53d   : > { %v3258_v56 = vpop.eup %2362  ;;  %1698 = vadd.xlane.f32.xlu1 %v1697_v43  ;;  %v1393_v11 = vpop.xlane.xlu0 %1392  ;;  %v1700_v23 = vadd.f32 %v3256_v48, %v3252_v3  ;;  %v3592_v43 = vld [vmem:[#allocation17_spill] sm:$0xff] }
 0x53e   : > { %v3262_v12 = vpop.eup %2364  ;;  %2378 = vpow2.f32 %v1577_v40  ;;  %v1465_v6 = vsub.f32 %v2997_v19, %v1393_v11  ;;  %v1466_v57 = vsub.f32 %v2999_v21, %v1393_v11 }
 0x53f   : > { %v3266_v38 = vpop.eup %2366  ;;  %2380 = vpow2.f32 %v1579_v59  ;;  %1701 = vadd.xlane.f32.xlu0 %v1700_v23  ;;  %v1691_v58 = vadd.f32 %v3262_v12, %v3258_v56 }
 0x540   : > { %v3270_v24 = vpop.eup %2368  ;;  %v1573_v17 = vmul.f32 1.442695, %v1465_v6  ;;  %v1575_v61 = vmul.f32 1.442695, %v1466_v57  ;;  %v3593_v57 = vld [vmem:[#allocation14_spill] sm:$0xff] }
 0x541   : > { %1692 = vadd.xlane.f32.xlu1 %v1691_v58  ;;  %v1390_v18 = vpop.xlane.xlu0 %1389  ;;  %v1694_v62 = vadd.f32 %v3270_v24, %v3266_v38 }
 0x542   : > { %2382 = vpow2.f32 %v1573_v17  ;;  %v1463_v19 = vsub.f32 %v2989_v13, %v1390_v18  ;;  %v1464_v21 = vsub.f32 %v2991_v16, %v1390_v18  ;;  %v3594_v17 = vld [vmem:[#allocation15_spill] sm:$0xff] }
 0x543   : > { %v3276_v5 = vpop.eup %2370  ;;  %2384 = vpow2.f32 %v1575_v61  ;;  %1695 = vadd.xlane.f32.xlu0 %v1694_v62 }
 0x544   : > { %v3278_v51 = vpop.eup %2372  ;;  %v1569_v15 = vmul.f32 1.442695, %v1463_v19  ;;  %v1571_v27 = vmul.f32 1.442695, %v1464_v21 }
 0x545   : > { %v1387_v25 = vpop.xlane.xlu0 %1386  ;;  %v1688_v7 = vadd.f32 %v3278_v51, %v3276_v5 }
 0x546   : > { %2386 = vpow2.f32 %v1569_v15  ;;  %v1461_v54 = vsub.f32 %v3591_v53, %v1387_v25  ;;  %v1462_v40 = vsub.f32 %v3592_v43, %v1387_v25  ;;  %v3595_v25 = vld [vmem:[#allocation12_spill] sm:$0xff]  ;;  %v3596_v53 = vld [vmem:[#allocation13_spill] sm:$0xff] }
 0x547   : > { %v3284_v13 = vpop.eup %2374  ;;  %2388 = vpow2.f32 %v1571_v27  ;;  %1689 = vadd.xlane.f32.xlu0 %v1688_v7 }
 0x548   : > { %v3286_v16 = vpop.eup %2376  ;;  %v1565_v59 = vmul.f32 1.442695, %v1461_v54  ;;  %v1567_v11 = vmul.f32 1.442695, %v1462_v40 }
 0x549   : > { %v1384_v23 = vpop.xlane.xlu0 %1383  ;;  %v1685_v6 = vadd.f32 %v3286_v16, %v3284_v13 }
 0x54a   : > { %2390 = vpow2.f32 %v1565_v59  ;;  %v1459_v58 = vsub.f32 %v3593_v57, %v1384_v23  ;;  %v1460_v61 = vsub.f32 %v3594_v17, %v1384_v23 }
 0x54b   : > { %v3292_v18 = vpop.eup %2378  ;;  %2392 = vpow2.f32 %v1567_v11  ;;  %1686 = vadd.xlane.f32.xlu1 %v1685_v6 }
 0x54c   : > { %v3294_v62 = vpop.eup %2380  ;;  %v1561_v19 = vmul.f32 1.442695, %v1459_v58  ;;  %v1563_v21 = vmul.f32 1.442695, %v1460_v61  ;;  %v3597_v58 = vld [vmem:[#allocation11_spill] sm:$0xff] }
 0x54d   : > { %v1381_v15 = vpop.xlane.xlu0 %1380  ;;  %v1682_v27 = vadd.f32 %v3294_v62, %v3292_v18 }
 0x54e   : > { %2394 = vpow2.f32 %v1561_v19  ;;  %v1457_v7 = vsub.f32 %v3595_v25, %v1381_v15  ;;  %v1458_v54 = vsub.f32 %v3596_v53, %v1381_v15  ;;  %v3598_v53 = vld [vmem:[#allocation10_spill] sm:$0xff] }
 0x54f   : > { %v3300_v43 = vpop.eup %2382  ;;  %2396 = vpow2.f32 %v1563_v21  ;;  %1683 = vadd.xlane.f32.xlu0 %v1682_v27 }
 0x550   : > { %v3302_v40 = vpop.eup %2384  ;;  %v1557_v59 = vmul.f32 1.442695, %v1457_v7  ;;  %v1559_v11 = vmul.f32 1.442695, %v1458_v54 }
 0x551   : > { %v1378_v23 = vpop.xlane.xlu0 %1377  ;;  %v1679_v6 = vadd.f32 %v3302_v40, %v3300_v43 }
 0x552   : > { %2398 = vpow2.f32 %v1557_v59  ;;  %v1455_v57 = vsub.f32 %v2957_v14, %v1378_v23  ;;  %v1456_v17 = vsub.f32 %v3597_v58, %v1378_v23 }
 0x553   : > { %v3308_v61 = vpop.eup %2386  ;;  %2400 = vpow2.f32 %v1559_v11  ;;  %1680 = vadd.xlane.f32.xlu1 %v1679_v6 }
 0x554   : > { %v3310_v19 = vpop.eup %2388  ;;  %v1553_v21 = vmul.f32 1.442695, %v1455_v57  ;;  %v1555_v15 = vmul.f32 1.442695, %v1456_v17 }
 0x555   : > { %v1375_v27 = vpop.xlane.xlu0 %1374  ;;  %v1676_v25 = vadd.f32 %v3310_v19, %v3308_v61 }
 0x556   : > { %2402 = vpow2.f32 %v1553_v21  ;;  %v1453_v7 = vsub.f32 %v2949_v2, %v1375_v27  ;;  %v1454_v54 = vsub.f32 %v3598_v53, %v1375_v27 }
 0x557   : > { %v3316_v14 = vpop.eup %2390  ;;  %2404 = vpow2.f32 %v1555_v15  ;;  %1677 = vadd.xlane.f32.xlu0 %v1676_v25 }
 0x558   : > { %v3318_v59 = vpop.eup %2392  ;;  %v1549_v11 = vmul.f32 1.442695, %v1453_v7  ;;  %v1551_v23 = vmul.f32 1.442695, %v1454_v54 }
 0x559   : > { %v1673_v6 = vadd.f32 %v3318_v59, %v3316_v14 }
 0x55a   : > { %2406 = vpow2.f32 %v1549_v11 }
 0x55b   : > { %v3322_v57 = vpop.eup %2394  ;;  %2408 = vpow2.f32 %v1551_v23  ;;  %1674 = vadd.xlane.f32.xlu1 %v1673_v6  ;;  %v664_v23 = vld [vmem:[%s3530_s5 + $0x48] sm:$0xff]  ;;  %v663_v6 = vld [vmem:[%s3530_s5 + $0x40] sm:$0xff] }
 0x55c   : > { %v3324_v58 = vpop.eup %2396 }
 0x55d   : > { %v1670_v2 = vadd.f32 %v3324_v58, %v3322_v57 }
 0x55f   : > { %v3328_v17 = vpop.eup %2398  ;;  %1671 = vadd.xlane.f32.xlu0 %v1670_v2  ;;  %v665_v2 = vld [vmem:[%s3530_s5 + $0x50] sm:$0xff] }
 0x560   : > { %3599 = vst [vmem:[#allocation18_spill] sm:$0xff] %v3328_v17  ;;  %v3330_v21 = vpop.eup %2400 }
 0x561   : > { %v1667_v15 = vadd.f32 %v3330_v21, %v3328_v17 }
 0x563   : > { %v3334_v27 = vpop.eup %2402  ;;  %1668 = vadd.xlane.f32.xlu1 %v1667_v15  ;;  %v666_v15 = vld [vmem:[%s3530_s5 + $0x58] sm:$0xff] }
 0x564   : > { %3600 = vst [vmem:[#allocation16_spill] sm:$0xff] %v3334_v27  ;;  %v3336_v25 = vpop.eup %2404 }
 0x565   : > { %3601 = vst [vmem:[#allocation17_spill] sm:$0xff] %v3336_v25  ;;  %v1664_v7 = vadd.f32 %v3336_v25, %v3334_v27 }
 0x567   : > { %v3340_v53 = vpop.eup %2406  ;;  %1665 = vadd.xlane.f32.xlu0 %v1664_v7  ;;  %v1898_v7 = vld [vmem:[%s3532_s7] sm:$0xff] }
 0x568   : > { %3602 = vst [vmem:[#allocation14_spill] sm:$0xff] %v3340_v53  ;;  %v3342_v54 = vpop.eup %2408 }
 0x569   : > { %3603 = vst [vmem:[#allocation15_spill] sm:$0xff] %v3342_v54  ;;  %v1661_v11 = vadd.f32 %v3342_v54, %v3340_v53 }
 0x56b   : > { %1662 = vadd.xlane.f32.xlu1 %v1661_v11  ;;  %v1899_v11 = vld [vmem:[%s3532_s7 + $0x8] sm:$0xff] }
 0x57c   : > { %714 = vperm.xlu1 %2273, %v664_v23  }
 0x57d   : > { %709 = vperm.xlu0 %2272, %v663_v6   ;;  %v1900_v6 = vld [vmem:[%s3532_s7 + $0x10] sm:$0xff] }
 0x580   : > { %719 = vperm.xlu1 %2273, %v665_v2   ;;  %v1901_v2 = vld [vmem:[%s3532_s7 + $0x18] sm:$0xff] }
 0x581   : > { %724 = vperm.xlu0 %2272, %v666_v15  }
 0x584   : > { %1904 = vperm.xlu1 %2273, %v1898_v7   ;;  %v1660_v23 = vpop.xlane.xlu1 %1659 }
 0x585   : > { %2410 = vrcp.f32 %v1660_v23  ;;  %1909 = vperm.xlu0 %2272, %v1899_v11  }
 0x588   : > { %1914 = vperm.xlu1 %2273, %v1900_v6   ;;  %v1657_v15 = vpop.xlane.xlu1 %1656 }
 0x589   : > { %2412 = vrcp.f32 %v1657_v15  ;;  %1919 = vperm.xlu0 %2272, %v1901_v2  }
 0x58c   : > { %v1654_v53 = vpop.xlane.xlu1 %1653 }
 0x58d   : > { %2414 = vrcp.f32 %v1654_v53 }
 0x590   : > { %v1651_v54 = vpop.xlane.xlu1 %1650 }
 0x591   : > { %2416 = vrcp.f32 %v1651_v54 }
 0x592   : > { %v2411_v7 = vpop.eup %2410 }
 0x593   : > { %v1772_v23 = vmul.f32 %v2411_v7, %v3104_v8  ;;  %v1771_v11 = vmul.f32 %v2411_v7, %v3102_v63 }
 0x594   : > { %v1648_v27 = vpop.xlane.xlu1 %1647 }
 0x595   : > { %2418 = vrcp.f32 %v1648_v27  ;;  %1805 = vmatprep.subr.mxu0 %v1772_v23 }
 0x596   : > { %v2413_v25 = vpop.eup %2412  ;;  %1806 = vmatpush1.xpose.msra.mxu0 %v1771_v11 }
 0x597   : > { %v1770_v17 = vmul.f32 %v2413_v25, %v3112_v50  ;;  %v1769_v6 = vmul.f32 %v2413_v25, %v3107_v47 }
 0x598   : > { %v1645_v15 = vpop.xlane.xlu1 %1644  ;;  %v1630_v23 = vpop.xlane.xlu0 %1629 }
 0x599   : > { %1807 = vmatprep.subr.mxu0 %v1770_v17  ;;  %2420 = vrcp.f32 %v1645_v15 }
 0x59a   : > { %v2415_v2 = vpop.eup %2414  ;;  %1808 = vmatpush1.xpose.msra.mxu0 %v1769_v6 }
 0x59b   : > { %v1768_v53 = vmul.f32 %v2415_v2, %v3122_v49  ;;  %v1767_v8 = vmul.f32 %v2415_v2, %v3117_v28 }
 0x59c   : > { %v1642_v54 = vpop.xlane.xlu1 %1641 }
 0x59d   : > { %1809 = vmatprep.subr.mxu0 %v1768_v53  ;;  %2422 = vrcp.f32 %v1642_v54  ;;  %v1624_v53 = vpop.xlane.xlu0 %1623 }
 0x59e   : > { %v2417_v63 = vpop.eup %2416  ;;  %1810 = vmatpush1.xpose.msra.mxu0 %v1767_v8 }
 0x59f   : > { %v1766_v27 = vmul.f32 %v2417_v63, %v3132_v31  ;;  %v1765_v50 = vmul.f32 %v2417_v63, %v3127_v1 }
 0x5a0   : > { %v1639_v7 = vpop.xlane.xlu1 %1638 }
 0x5a1   : > { %1811 = vmatprep.subr.mxu0 %v1766_v27  ;;  %2424 = vrcp.f32 %v1639_v7 }
 0x5a2   : > { %v2419_v47 = vpop.eup %2418  ;;  %1812 = vmatpush1.xpose.msra.mxu0 %v1765_v50  ;;  %v1618_v50 = vpop.xlane.xlu0 %1617 }
 0x5a3   : > { %v1764_v17 = vmul.f32 %v2419_v47, %v3142_v26  ;;  %v1763_v49 = vmul.f32 %v2419_v47, %v3137_v60 }
 0x5a4   : > { %v1636_v25 = vpop.xlane.xlu1 %1635 }
 0x5a5   : > { %2426 = vrcp.f32 %v1636_v25  ;;  %1813 = vmatprep.subr.mxu0 %v1764_v17  ;;  %v3604_v25 = vld [vmem:[#allocation6_spill] sm:$0xff] }
 0x5a6   : > { %1814 = vmatpush1.xpose.msra.mxu0 %v1763_v49  ;;  %v2421_v28 = vpop.eup %2420 }
 0x5a7   : > { %v1762_v31 = vmul.f32 %v2421_v28, %v3150_v9  ;;  %v1761_v1 = vmul.f32 %v2421_v28, %v3146_v22  ;;  %v3605_v28 = vld [vmem:[#allocation7_spill] sm:$0xff] }
 0x5a8   : > { %v1633_v11 = vpop.xlane.xlu1 %1632 }
 0x5a9   : > { %2428 = vrcp.f32 %v1633_v11  ;;  %1815 = vmatprep.subr.mxu0 %v1762_v31  ;;  %v3606_v31 = vld [vmem:[#allocation9_spill] sm:$0xff] }
 0x5aa   : > { %2430 = vrcp.f32 %v1630_v23  ;;  %v2423_v6 = vpop.eup %2422  ;;  %1816 = vmatpush1.xpose.msra.mxu0 %v1761_v1 }
 0x5ab   : > { %v1760_v26 = vmul.f32 %v2423_v6, %v3164_v30  ;;  %v1759_v60 = vmul.f32 %v2423_v6, %v3157_v4 }
 0x5ac   : > { %v1627_v15 = vpop.xlane.xlu1 %1626 }
 0x5ad   : > { %2432 = vrcp.f32 %v1627_v15  ;;  %1817 = vmatprep.subr.mxu0 %v1760_v26  ;;  %v3607_v15 = vld [vmem:[#allocation19_spill] sm:$0xff] }
 0x5ae   : > { %v2425_v2 = vpop.eup %2424  ;;  %1818 = vmatpush1.xpose.msra.mxu0 %v1759_v60  ;;  %2434 = vrcp.f32 %v1624_v53  ;;  %v3608_v60 = vld [vmem:[#allocation5_spill] sm:$0xff] }
 0x5af   : > { %v1758_v8 = vmul.f32 %v2425_v2, %v3178_v10  ;;  %v1757_v9 = vmul.f32 %v2425_v2, %v3171_v39 }
 0x5b0   : > { %v1621_v54 = vpop.xlane.xlu1 %1620 }
 0x5b1   : > { %1819 = vmatprep.subr.mxu0 %v1758_v8  ;;  %2436 = vrcp.f32 %v1621_v54 }
 0x5b2   : > { %v2427_v22 = vpop.eup %2426  ;;  %1820 = vmatpush1.xpose.msra.mxu0 %v1757_v9  ;;  %2438 = vrcp.f32 %v1618_v50  ;;  %v3609_v9 = vld [vmem:[#allocation8_spill] sm:$0xff] }
 0x5b3   : > { %v1756_v63 = vmul.f32 %v2427_v22, %v3190_v0  ;;  %v1755_v30 = vmul.f32 %v2427_v22, %v3184_v37 }
 0x5b4   : > { %v1615_v17 = vpop.xlane.xlu1 %1614 }
 0x5b5   : > { %1821 = vmatprep.subr.mxu0 %v1756_v63  ;;  %2440 = vrcp.f32 %v1615_v17 }
 0x5b6   : > { %v2429_v4 = vpop.eup %2428  ;;  %1822 = vmatpush1.xpose.msra.mxu0 %v1755_v30 }
 0x5b7   : > { %v2431_v27 = vpop.eup %2430  ;;  %v1754_v7 = vmul.f32 %v2429_v4, %v3196_v46  ;;  %v1753_v10 = vmul.f32 %v2429_v4, %v3192_v41 }
 0x5b8   : > { %v1752_v39 = vmul.f32 %v2431_v27, %v3154_v32  ;;  %v1751_v37 = vmul.f32 %v2431_v27, %v3152_v34 }
 0x5b9   : > { %1823 = vmatprep.subr.mxu0 %v1754_v7 }
 0x5ba   : > { %v2433_v47 = vpop.eup %2432  ;;  %1824 = vmatpush1.xpose.msra.mxu0 %v1753_v10 }
 0x5bb   : > { %1825 = vmatprep.subr.mxu0 %v1752_v39  ;;  %v1750_v0 = vmul.f32 %v2433_v47, %v3200_v29  ;;  %v2435_v49 = vpop.eup %2434  ;;  %v1749_v46 = vmul.f32 %v2433_v47, %v3604_v25 }
 0x5bc   : > { %v1748_v41 = vmul.f32 %v2435_v49, %v3605_v28  ;;  %v1747_v1 = vmul.f32 %v2435_v49, %v3606_v31 }
 0x5be   : > { %1826 = vmatpush1.xpose.msra.mxu0 %v1751_v37  ;;  %v2437_v23 = vpop.eup %2436 }
 0x5bf   : > { %1827 = vmatprep.subr.mxu0 %v1750_v0  ;;  %v1746_v34 = vmul.f32 %v2437_v23, %v3208_v52  ;;  %v2439_v6 = vpop.eup %2438  ;;  %v1745_v26 = vmul.f32 %v2437_v23, %v3607_v15 }
 0x5c0   : > { %v1705_v11 = vpop.xlane.xlu1 %1704  ;;  %v1744_v2 = vmul.f32 %v2439_v6, %v3608_v60  ;;  %v1743_v22 = vmul.f32 %v2439_v6, %v3609_v9 }
 0x5c2   : > { %1828 = vmatpush1.xpose.msra.mxu0 %v1749_v46  ;;  %v2441_v53 = vpop.eup %2440 }
 0x5c3   : > { %1829 = vmatprep.subr.mxu0 %v1748_v41  ;;  %v1742_v54 = vmul.f32 %v2441_v53, %v3216_v33  ;;  %v1741_v52 = vmul.f32 %v2441_v53, %v3212_v35 }
 0x5c4   : > { %v1708_v32 = vpop.xlane.xlu0 %1707 }
 0x5c5   : > { %2442 = vrcp.f32 %v1708_v32 }
 0x5c6   : > { %2444 = vrcp.f32 %v1705_v11  ;;  %1830 = vmatpush1.xpose.msra.mxu0 %v1747_v1  ;;  %v1699_v8 = vpop.xlane.xlu1 %1698 }
 0x5c7   : > { %1831 = vmatprep.subr.mxu0 %v1746_v34  ;;  %v877_v34 = vpop.f32.mrf.mxu0 }
 0x5c8   : > { %v1702_v29 = vpop.xlane.xlu0 %1701 }
 0x5c9   : > { %2446 = vrcp.f32 %v1702_v29  ;;  %v879_v15 = vpop.f32.mrf.mxu0 }
 0x5ca   : > { %1832 = vmatpush1.xpose.msra.mxu0 %v1745_v26  ;;  %2448 = vrcp.f32 %v1699_v8  ;;  %v1693_v27 = vpop.xlane.xlu1 %1692 }
 0x5cb   : > { %1833 = vmatprep.subr.mxu0 %v1744_v2 }
 0x5cc   : > { %v1696_v63 = vpop.xlane.xlu0 %1695 }
 0x5cd   : > { %2450 = vrcp.f32 %v1696_v63 }
 0x5ce   : > { %1834 = vmatpush1.xpose.msra.mxu0 %v1743_v22  ;;  %2452 = vrcp.f32 %v1693_v27 }
 0x5cf   : > { %1835 = vmatprep.subr.mxu0 %v1742_v54  ;;  %v883_v54 = vpop.f32.mrf.mxu0 }
 0x5d0   : > { %v1690_v33 = vpop.xlane.xlu0 %1689 }
 0x5d1   : > { %2454 = vrcp.f32 %v1690_v33 }
 0x5d2   : > { %v2443_v30 = vpop.eup %2442  ;;  %1836 = vmatpush1.xpose.msra.mxu0 %v1741_v52 }
 0x5d3   : > { %v2445_v4 = vpop.eup %2444  ;;  %v1804_v50 = vmul.f32 %v2443_v30, %v3242_v55  ;;  %v1803_v7 = vmul.f32 %v2443_v30, %v3240_v42  ;;  %v885_v30 = vpop.f32.mrf.mxu0 }
 0x5d4   : > { %v1802_v10 = vmul.f32 %v2445_v4, %v3234_v44  ;;  %v1801_v47 = vmul.f32 %v2445_v4, %v3232_v45  ;;  %v1687_v37 = vpop.xlane.xlu1 %1686  ;;  %v3611_v4 = vld [vmem:[#allocation17_spill] sm:$0xff] }
 0x5d5   : > { %1837 = vmatprep.subr.mxu0 %v1804_v50  ;;  %2456 = vrcp.f32 %v1687_v37 }
 0x5d6   : > { %v2447_v39 = vpop.eup %2446  ;;  %1838 = vmatpush2.xpose.msra.mxu0 %v1803_v7  ;;  %v889_v7 = vpop.f32.mrf.mxu0 }
 0x5d7   : > { %1839 = vmatprep.subr.mxu0 %v1802_v10  ;;  %v1800_v35 = vmul.f32 %v2447_v39, %v3256_v48  ;;  %v2449_v17 = vpop.eup %2448  ;;  %v1799_v55 = vmul.f32 %v2447_v39, %v3252_v3  ;;  %v3613_v10 = vld [vmem:[#allocation15_spill] sm:$0xff] }
 0x5d8   : > { %v1798_v42 = vmul.f32 %v2449_v17, %v3248_v36  ;;  %v1684_v44 = vpop.xlane.xlu0 %1683  ;;  %v1797_v49 = vmul.f32 %v2449_v17, %v3244_v20 }
 0x5d9   : > { %2458 = vrcp.f32 %v1684_v44 }
 0x5da   : > { %1840 = vmatpush2.xpose.msra.mxu0 %v1801_v47  ;;  %v2451_v0 = vpop.eup %2450  ;;  %v891_v47 = vpop.f32.mrf.mxu0 }
 0x5db   : > { %1841 = vmatprep.subr.mxu0 %v1800_v35  ;;  %v1796_v45 = vmul.f32 %v2451_v0, %v3270_v24  ;;  %v2453_v25 = vpop.eup %2452  ;;  %v1795_v46 = vmul.f32 %v2451_v0, %v3266_v38 }
 0x5dc   : > { %v1681_v48 = vpop.xlane.xlu1 %1680  ;;  %v1794_v3 = vmul.f32 %v2453_v25, %v3262_v12  ;;  %v1793_v41 = vmul.f32 %v2453_v25, %v3258_v56  ;;  %v895_v37 = vpop.f32.mrf.mxu0 }
 0x5dd   : > { %2460 = vrcp.f32 %v1681_v48 }
 0x5de   : > { %1842 = vmatpush2.xpose.msra.mxu0 %v1799_v55  ;;  %v2455_v28 = vpop.eup %2454  ;;  %v897_v44 = vpop.f32.mrf.mxu0 }
 0x5df   : > { %1843 = vmatprep.subr.mxu0 %v1798_v42  ;;  %v1792_v20 = vmul.f32 %v2455_v28, %v3278_v51  ;;  %v1791_v11 = vmul.f32 %v2455_v28, %v3276_v5 }
 0x5e0   : > { %v1678_v36 = vpop.xlane.xlu0 %1677 }
 0x5e1   : > { %2462 = vrcp.f32 %v1678_v36 }
 0x5e2   : > { %1844 = vmatpush2.xpose.msra.mxu0 %v1797_v49  ;;  %v2457_v23 = vpop.eup %2456 }
 0x5e3   : > { %1845 = vmatprep.subr.mxu0 %v1796_v45  ;;  %v1790_v38 = vmul.f32 %v2457_v23, %v3286_v16  ;;  %v1789_v31 = vmul.f32 %v2457_v23, %v3284_v13 }
 0x5e4   : > { %v1675_v24 = vpop.xlane.xlu1 %1674 }
 0x5e5   : > { %2464 = vrcp.f32 %v1675_v24 }
 0x5e6   : > { %1846 = vmatpush2.xpose.msra.mxu0 %v1795_v46  ;;  %v2459_v32 = vpop.eup %2458 }
 0x5e7   : > { %1847 = vmatprep.subr.mxu0 %v1794_v3  ;;  %v1788_v56 = vmul.f32 %v2459_v32, %v3294_v62  ;;  %v1787_v5 = vmul.f32 %v2459_v32, %v3292_v18  ;;  %v1895_v32 = vld [vmem:[%s3531_s6 + $0x8] sm:$0xff] }
 0x5e8   : > { %v1672_v12 = vpop.xlane.xlu0 %1671 }
 0x5e9   : > { %2466 = vrcp.f32 %v1672_v12  ;;  %v1896_v12 = vld [vmem:[%s3531_s6 + $0x10] sm:$0xff] }
 0x5ea   : > { %1848 = vmatpush2.xpose.msra.mxu0 %v1793_v41  ;;  %v2461_v1 = vpop.eup %2460 }
 0x5eb   : > { %1849 = vmatprep.subr.mxu0 %v1792_v20  ;;  %v1786_v16 = vmul.f32 %v2461_v1, %v3302_v40  ;;  %v1785_v60 = vmul.f32 %v2461_v1, %v3300_v43 }
 0x5ec   : > { %v1669_v51 = vpop.xlane.xlu1 %1668 }
 0x5ed   : > { %2468 = vrcp.f32 %v1669_v51 }
 0x5ee   : > { %1850 = vmatpush2.xpose.msra.mxu0 %v1791_v11  ;;  %v2463_v29 = vpop.eup %2462  ;;  %v1894_v11 = vld [vmem:[%s3531_s6] sm:$0xff] }
 0x5ef   : > { %1851 = vmatprep.subr.mxu0 %v1790_v38  ;;  %v1784_v62 = vmul.f32 %v2463_v29, %v3310_v19  ;;  %v1783_v18 = vmul.f32 %v2463_v29, %v3308_v61  ;;  %v3610_v61 = vld [vmem:[#allocation18_spill] sm:$0xff]  ;;  %v3615_v38 = vmov 0.0  }
 0x5f0   : > { %v1666_v6 = vpop.xlane.xlu0 %1665 }
 0x5f1   : > { %2470 = vrcp.f32 %v1666_v6  ;;  %v2474_v6 = vld [vmem:[%s2647_s21] sm:$0xff] }
 0x5f2   : > { %1852 = vmatpush2.xpose.msra.mxu0 %v1789_v31  ;;  %v2465_v2 = vpop.eup %2464  ;;  %v1897_v31 = vld [vmem:[%s3531_s6 + $0x18] sm:$0xff] }
 0x5f3   : > { %1853 = vmatprep.subr.mxu0 %v1788_v56  ;;  %v1782_v40 = vmul.f32 %v2465_v2, %v3318_v59  ;;  %v1781_v9 = vmul.f32 %v2465_v2, %v3316_v14  ;;  %v3612_v14 = vld [vmem:[#allocation16_spill] sm:$0xff]  ;;  %v2476_v2 = vld [vmem:[%s2647_s21 + $0x10] sm:$0xff] }
 0x5f4   : > { %v1663_v53 = vpop.xlane.xlu1 %1662 }
 0x5f5   : > { %2472 = vrcp.f32 %v1663_v53 }
 0x5f6   : > { %1854 = vmatpush2.xpose.msra.mxu0 %v1787_v5  ;;  %v2467_v8 = vpop.eup %2466 }
 0x5f7   : > { %1855 = vmatprep.subr.mxu0 %v1786_v16  ;;  %v1780_v43 = vmul.f32 %v2467_v8, %v3324_v58  ;;  %v1779_v19 = vmul.f32 %v2467_v8, %v3322_v57 }
 0x5f8   : > { %v710_v26 = vpop.permute.xlu0 %709  ;;  %v715_v57 = vpop.permute.xlu1 %714 }
 0x5f9   : > { %v880_v13 = vadd.f32 %v879_v15, %v710_v26  ;;  %v878_v35 = vadd.f32 %v877_v34, %v710_v26  ;;  %v886_v17 = vadd.f32 %v885_v30, %v715_v57  ;;  %v884_v42 = vadd.f32 %v883_v54, %v715_v57  ;;  %v2475_v26 = vld [vmem:[%s2647_s21 + $0x8] sm:$0xff]  ;;  %v2478_v54 = vld [vmem:[%s2647_s21 + $0x20] sm:$0xff] }
 0x5fa   : > { %1856 = vmatpush2.xpose.msra.mxu0 %v1785_v60  ;;  %v2469_v22 = vpop.eup %2468  ;;  %v2479_v30 = vld [vmem:[%s2647_s21 + $0x28] sm:$0xff] }
 0x5fb   : > { %1869 = vmatprep.mubr.f32.mxu0 %v880_v13  ;;  %1857 = vmatprep.subr.mxu0 %v1784_v62  ;;  %v1778_v63 = vmul.f32 %v2469_v22, %v3330_v21  ;;  %v1777_v59 = vmul.f32 %v2469_v22, %v3610_v61  ;;  %v3614_v21 = vld [vmem:[#allocation14_spill] sm:$0xff] }
 0x5fc   : > { %v720_v55 = vpop.permute.xlu1 %719  ;;  %v725_v49 = vpop.permute.xlu0 %724 }
 0x5fd   : > { %v892_v0 = vadd.f32 %v891_v47, %v720_v55  ;;  %v890_v45 = vadd.f32 %v889_v7, %v720_v55  ;;  %v898_v25 = vadd.f32 %v897_v44, %v725_v49  ;;  %v896_v48 = vadd.f32 %v895_v37, %v725_v49 }
 0x5fe   : > { %1858 = vmatpush2.xpose.msra.mxu0 %v1783_v18  ;;  %v2471_v52 = vpop.eup %2470 }
 0x5ff   : > { %1859 = vmatprep.subr.mxu0 %v1782_v40  ;;  %v1776_v27 = vmul.f32 %v2471_v52, %v3611_v4  ;;  %v1775_v58 = vmul.f32 %v2471_v52, %v3612_v14  ;;  %v2480_v14 = vld [vmem:[%s2647_s21 + $0x30] sm:$0xff] }
 0x600   : > { %v1905_v56 = vpop.permute.xlu1 %1904  ;;  %v1910_v29 = vpop.permute.xlu0 %1909 }
 0x602   : > { %1860 = vmatpush2.xpose.msra.mxu0 %v1781_v9  ;;  %v2473_v50 = vpop.eup %2472  ;;  %v2477_v9 = vld [vmem:[%s2647_s21 + $0x18] sm:$0xff] }
 0x603   : > { %1861 = vmatprep.subr.mxu0 %v1780_v43  ;;  %v1774_v39 = vmul.f32 %v2473_v50, %v3613_v10  ;;  %v1773_v33 = vmul.f32 %v2473_v50, %v3614_v21  ;;  %v2481_v10 = vld [vmem:[%s2647_s21 + $0x38] sm:$0xff] }
 0x604   : > { %v1915_v40 = vpop.permute.xlu1 %1914  ;;  %v1920_v61 = vpop.permute.xlu0 %1919 }
 0x606   : > { %1862 = vmatpush2.xpose.msra.mxu0 %v1779_v19 }
 0x607   : > { %1863 = vmatprep.subr.mxu0 %v1778_v63 }
 0x60a   : > { %1864 = vmatpush2.xpose.msra.mxu0 %v1777_v59 }
 0x60b   : > { %1865 = vmatprep.subr.mxu0 %v1776_v27 }
 0x60e   : > { %1866 = vmatpush2.xpose.msra.mxu0 %v1775_v58 }
 0x60f   : > { %1867 = vmatprep.subr.mxu0 %v1774_v39 }
 0x612   : > { %1868 = vmatpush2.xpose.msra.mxu0 %v1773_v33 }
 0x615   : > { %1870 = vmatmul.mubr.f32.vlgmr.msra.gmra.mxu0 %v878_v35 }
 0x616   : > { %1875 = vmatprep.mubr.f32.mxu0 %v886_v17 }
 0x619   : > { %1876 = vmatmul.mubr.f32.gmra.mxu0 %v884_v42 }
 0x61a   : > { %1881 = vmatprep.mubr.f32.mxu0 %v892_v0 }
 0x61d   : > { %1882 = vmatmul.mubr.f32.gmra.mxu0 %v890_v45 }
 0x61e   : > { %1887 = vmatprep.mubr.f32.mxu0 %v898_v25 }
 0x621   : > { %1888 = vmatmul.mubr.f32.gmra.mxu0 %v896_v48 }
 0x6d5   : > { %v1871_v46 = vpop.f32.mrf.mxu0 }
 0x6d7   : > { %v1873_v3 = vpop.f32.mrf.mxu0 }
 0x6d9   : > { %v1877_v28 = vpop.f32.mrf.mxu0 }
 0x6db   : > { %v1879_v36 = vpop.f32.mrf.mxu0 }
 0x6dd   : > { %v1883_v41 = vpop.f32.mrf.mxu0 }
 0x6df   : > { %v1885_v20 = vpop.f32.mrf.mxu0 }
 0x6e1   : > { %v1889_v23 = vpop.f32.mrf.mxu0 }
 0x6e3   : > { %v1891_v24 = vpop.f32.mrf.mxu0 }
 0x6e4   : > { %1958 = vmatprep.subr.mxu1 %v1891_v24 }
 0x6e5   : > { %1959 = vmatpush1.msra.mxu1 %v1889_v23 }
 0x6e6   : > { %1960 = vmatprep.subr.mxu1 %v1885_v20 }
 0x6e7   : > { %1961 = vmatpush1.msra.mxu1 %v1883_v41 }
 0x6e8   : > { %1962 = vmatprep.subr.mxu1 %v1879_v36 }
 0x6e9   : > { %1963 = vmatpush1.msra.mxu1 %v1877_v28 }
 0x6ea   : > { %1964 = vmatprep.subr.mxu1 %v1873_v3 }
 0x6eb   : > { %1965 = vmatpush1.msra.mxu1 %v1871_v46 }
 0x6ec   : > { %2174 = vmatmul.mubr.msk.f32.vlgmr.msra.gmra.mxu1 %vm348_vm0, %v1894_v11 }
 0x6ed   : > { %2004 = vmatprep.mubr.f32.mxu1 %v3615_v38 }
 0x6f0   : > { %2175 = vmatmul.mubr.msk.f32.gmra.mxu1 %vm348_vm0, %v1895_v32 }
 0x6f1   : > { %2010 = vmatprep.mubr.f32.mxu1 %v3615_v38 }
 0x6f4   : > { %2176 = vmatmul.mubr.msk.f32.gmra.mxu1 %vm348_vm0, %v1896_v12 }
 0x6f5   : > { %2016 = vmatprep.mubr.f32.mxu1 %v3615_v38 }
 0x6f8   : > { %2177 = vmatmul.mubr.msk.f32.gmra.mxu1 %vm348_vm0, %v1897_v31 }
 0x7ac   : > { %v2000_v1 = vpop.f32.mrf.mxu1 }
 0x7ad   : > { %v2001_v51 = vadd.f32 %v2000_v1, %v1905_v56 }
 0x7ae   : > { %v2002_v34 = vpop.f32.mrf.mxu1 }
 0x7af   : > { %v2023_v5 = vadd.f32 %v2474_v6, %v2001_v51  ;;  %v2003_v16 = vadd.f32 %v2002_v34, %v1905_v56 }
 0x7b0   : > { %v2006_v15 = vpop.f32.mrf.mxu1 }
 0x7b1   : > { %2031 = vst [vmem:[%s3457_s12] sm:$0xff] %v2023_v5  ;;  %v2024_v13 = vadd.f32 %v2475_v26, %v2003_v16  ;;  %v2007_v60 = vadd.f32 %v2006_v15, %v1910_v29 }
 0x7b2   : > { %v2008_v62 = vpop.f32.mrf.mxu1 }
 0x7b3   : > { %2032 = vst [vmem:[%s3457_s12 + $0x8] sm:$0xff] %v2024_v13  ;;  %v2025_v53 = vadd.f32 %v2476_v2, %v2007_v60  ;;  %v2009_v18 = vadd.f32 %v2008_v62, %v1910_v29 }
 0x7b4   : > { %v2012_v8 = vpop.f32.mrf.mxu1 }
 0x7b5   : > { %2033 = vst [vmem:[%s3457_s12 + $0x10] sm:$0xff] %v2025_v53  ;;  %v2026_v43 = vadd.f32 %v2477_v9, %v2009_v18  ;;  %v2013_v22 = vadd.f32 %v2012_v8, %v1915_v40 }
 0x7b6   : > { %v2014_v19 = vpop.f32.mrf.mxu1 }
 0x7b7   : > { %2034 = vst [vmem:[%s3457_s12 + $0x18] sm:$0xff] %v2026_v43  ;;  %v2027_v63 = vadd.f32 %v2478_v54, %v2013_v22  ;;  %v2015_v52 = vadd.f32 %v2014_v19, %v1915_v40 }
 0x7b8   : > { %v2018_v59 = vpop.f32.mrf.mxu1 }
 0x7b9   : > { %2035 = vst [vmem:[%s3457_s12 + $0x20] sm:$0xff] %v2027_v63  ;;  %v2028_v4 = vadd.f32 %v2479_v30, %v2015_v52  ;;  %v2019_v27 = vadd.f32 %v2018_v59, %v1920_v61 }
 0x7ba   : > { %v2020_v50 = vpop.f32.mrf.mxu1 }
 0x7bb   : > { %2036 = vst [vmem:[%s3457_s12 + $0x28] sm:$0xff] %v2028_v4  ;;  %v2029_v58 = vadd.f32 %v2480_v14, %v2019_v27  ;;  %v2021_v7 = vadd.f32 %v2020_v50, %v1920_v61 }
 0x7bd   : > { %2037 = vst [vmem:[%s3457_s12 + $0x30] sm:$0xff] %v2029_v58  ;;  %v2030_v39 = vadd.f32 %v2481_v10, %v2021_v7 }
 0x7bf   : > { %2038 = vst [vmem:[%s3457_s12 + $0x38] sm:$0xff] %v2030_v39 }
 0x7c0   : > { %2495 = shalt.err (!%p2492_p3)
}
 0x7c1   : > { %s2496_s21 = scalar_lea.hbm %s3476_s20, 1024  ;;  %s2500_s12 = scalar_lea.hbm %s3533_s8, 2048 }
 0x7c2   : > { %p2497_p4 = scmp.ne.s32.totalorder %s3476_s20, %s2496_s21  ;;  %p2501_p9 = scmp.lt.s32.totalorder %s3476_s20, %s3533_s8 }
 0x7c3   : > { %p2502_p10 = scmp.lt.s32.totalorder %s2500_s12, %s2496_s21 }
 0x7c4   : > { %p2498_p7 = pnand %p2497_p4, %p2632_p5 }
 0x7c5   : > { %p2503_p11 = por %p2502_p10, %p2501_p9 }
 0x7c6   : > { %p2499_p8 = pneg %p2498_p7 }
 0x7c8   : > { %p2504_p12 = pnand %p2503_p11, %p2499_p8 }
 0x7ca   : > { %2507 = shalt.err (!%p2504_p12)
}
 0x7cb   : > { %s2547_s19 = smov 256   ;;  %s2548_s22 = smov 16  }
 0x7cc   : > { %2229 = dma.vmem_to_hbm [thread:$0]  (%p2632_p5), %s3478_s17, 1024, %s3476_s20, %s3485_s9, %s2547_s19, %s2547_s19, %s2548_s22  }
 0x7cd PF: > { %p2235_p13 = scmp.ge.s32.totalorder %s2542_s30, 2  ;;  %s2068_s23 = sand.u32 1, %s2530_s27  }
 0x7ce   : > { %s2069_s24 = scalar_lea.sflag [#allocation3], %s2068_s23 }
 0x7cf   : > { %p2232_p0 = pnand %p2235_p13, %p2636_p6 }
 0x7d1   : > { %p2233_p1 = pneg %p2232_p0 }
 0x7d3   : > { %2525 = dma.done.wait (%p2233_p1), %s2069_s24, 1024  }
 0x7d4   : > { %2527 = vsyncadd (%p2233_p1), %s2069_s24, 4294966272  ;;  %p18_p2 = scmp.ge.s32.totalorder %s2619_s11, 4   ;;  %s3616_s27 = smov %s2534_s28 }
 0x7d5   : > { %s3617_s28 = smov %s2538_s29  ;;  %s3618_s29 = smov %s2630_s14 }
 0x7d6   : > { %s3619_s30 = smov %s2619_s11  ;;  %20 = sbr.rel (!%p18_p2) target bundleno = 3 (0x3), region = 87 }
 0x7db   :  { %2074 = vsyncpa [#allocation3], 1 }
 0x7dc   :  { %2076 = vsyncpa [#allocation3 + $0x1], 1 }

</bundles_post_ra>
